<compile_context>
chip_gen: v7x
topology: tpu7x:2x2x1
jax: 0.10.0
libtpu: 0.0.40
codegen_flags: <defaults>
</compile_context>

<pallas_src>
import math
import functools

import numpy as np
import jax
import jax.numpy as jnp
from jax.experimental import pallas as pl
from jax.experimental.pallas import tpu as pltpu


def _kpconv_kernel(c_ref, f_ref, w_ref, o_ref, *, kp_list, inv_extent):
    """One tile of TN query points (TN on the lane axis everywhere).

    c_ref : [3, M, TN]       centered neighbor coords (neighbor - query), f32
    f_ref : [Cin, M, TN]     gathered neighbor features (shadow rows = 0)
    w_ref : [Cout, K*Cin]    kernel weights, transposed + flattened over (k,cin)
    o_ref : [Cout, TN]       lane-dense output slab
    kp_list : static tuple of K (x, y, z) kernel-point coords (closure consts)
    """
    f32 = jnp.float32
    cx = c_ref[0].astype(f32)                       # [M, TN]
    cy = c_ref[1].astype(f32)
    cz = c_ref[2].astype(f32)

    feat = f_ref[...].astype(f32)                   # [Cin, M, TN]

    # Per kernel point: direct (c - kp)^2 distance (no cancellation), linear
    # influence, then a VPU broadcast-multiply + sublane reduce over the M
    # neighbors. Everything is [*, M, TN] → full 128-lane utilization.
    parts = []
    for (kx, ky, kz) in kp_list:
        dx = cx - kx
        dy = cy - ky
        dz = cz - kz
        d2 = dx * dx + dy * dy + dz * dz            # [M, TN]
        dist = jnp.sqrt(d2)                         # EUP
        # KP_influence == "linear": clamp(1 - d / extent, min=0)
        infl = jnp.maximum(1.0 - dist * inv_extent, 0.0)          # [M, TN]
        # aggregation_mode == "sum": reduce over neighbors (sublane axis).
        wk = jnp.sum(infl[None, :, :] * feat, axis=1)             # [Cin, TN]
        parts.append(wk)

    # Sublane-axis concat of K aligned [Cin, TN] tiles → [K*Cin, TN]
    # (no relayout when Cin % 8 == 0).
    weighted = jnp.concatenate(parts, axis=0)       # [K*Cin, TN]

    # Single fused MXU matmul, lane-dense result: [Cout, K*Cin] x [K*Cin, TN].
    out = jnp.dot(w_ref[...], weighted.astype(w_ref.dtype),
                  preferred_element_type=f32)       # [Cout, TN]
    o_ref[...] = out.astype(o_ref.dtype)


def _round_up(a, b):
    return ((a + b - 1) // b) * b


def kpconv_forward(query_points, support_points, neighbors, x,
                   K_points, weight, point_influence, *, tile_n=512):
    """Equivalent of KPConvLayer.forward / KPConv_ops (linear, sum).

    query_points  : [N, 3]
    support_points: [N0, 3]
    neighbors     : [N, M] int indices into support (index N0 == shadow)
    x             : [N0, Cin]
    K_points      : [K, 3]  fixed kernel-point dispositions
    weight        : [K, Cin, Cout]
    returns       : [N, Cout]
    """
    N, dim = query_points.shape
    Kpts, Cin, Cout = weight.shape
    M = neighbors.shape[1]

    # ---- wrapper-side glue (same as reference KPConv_ops) -------------------
    # TODO(synk): for very large clouds move the gather in-kernel (scalar-
    # prefetched `neighbors` + DMA row gather) to kill the Mx-duplicated
    # [N, M, Cin] HBM stream (binding first on v5e's ~0.8 TB/s HBM).
    support_ext = jnp.concatenate(
        [support_points, jnp.full((1, dim), 1e6, support_points.dtype)], axis=0)
    feat_ext = jnp.concatenate([x, jnp.zeros((1, Cin), x.dtype)], axis=0)
    nb_coords = support_ext[neighbors]                        # [N, M, 3]
    nb_feats = feat_ext[neighbors]                            # [N, M, Cin]

    # Coordinate math stays f32 (1e6 shadow point squared ≈ 1e12).
    centered = (nb_coords - query_points[:, None, :]).astype(jnp.float32)

    # Transposed, lane-dense layouts: point index last.
    c_t = jnp.transpose(centered, (2, 1, 0))                  # [3, M, N]
    f_t = jnp.transpose(nb_feats, (2, 1, 0))                  # [Cin, M, N]
    w_t = jnp.transpose(weight.reshape(Kpts * Cin, Cout))     # [Cout, K*Cin]

    # ---- tile sizing ---------------------------------------------------------
    # Big lane-dense tiles, but (a) keep >= 2 grid tiles for small clouds so
    # v7x's two TensorCores both get work, and (b) keep double-buffered input
    # tiles under ~24 MiB for v7x's 64 MiB physical / 32 MiB default scoped VMEM.
    tile_n = max(128, min(int(tile_n), _round_up(pl.cdiv(N, 2), 128)))
    bytes_per_col = (3 * M + Cin * M + Cout) * 4
    vmem_budget = 24 * 1024 * 1024
    max_tile = max(128, (vmem_budget // (2 * bytes_per_col)) // 128 * 128)
    tile_n = min(tile_n, max_tile)

    n_pad = (-N) % tile_n
    Np = N + n_pad
    # Padded columns have zero features -> zero outputs, sliced off below.
    c_t = jnp.pad(c_t, ((0, 0), (0, 0), (0, n_pad)))
    f_t = jnp.pad(f_t, ((0, 0), (0, 0), (0, n_pad)))

    # Kernel points are fixed (requires_grad=False) dispositions: bake them
    # into the kernel as closure constants (no VMEM block, no per-tile slices).
    kp_host = np.asarray(jax.device_get(K_points), dtype=np.float64)
    kp_list = tuple((float(p[0]), float(p[1]), float(p[2])) for p in kp_host)

    kernel = functools.partial(
        _kpconv_kernel,
        kp_list=kp_list,
        inv_extent=1.0 / float(point_influence),
    )

    out_t = pl.pallas_call(
        kernel,
        out_shape=jax.ShapeDtypeStruct((Cout, Np), x.dtype),
        grid_spec=pltpu.PrefetchScalarGridSpec(
            num_scalar_prefetch=0,
            grid=(Np // tile_n,),
            in_specs=[
                pl.BlockSpec((3, M, tile_n), lambda i: (0, 0, i)),
                pl.BlockSpec((Cin, M, tile_n), lambda i: (0, 0, i)),
                pl.BlockSpec((Cout, Kpts * Cin), lambda i: (0, 0)),
            ],
            # Lane-dense output slab: tile_n (multiple of 128) on the lane axis
            # -> unmasked vector stores.
            out_specs=pl.BlockSpec((Cout, tile_n), lambda i: (0, i)),
        ),
        compiler_params=pltpu.CompilerParams(
            dimension_semantics=("parallel",)),
    )(c_t, f_t, w_t)

    return jnp.transpose(out_t[:, :N])                        # [N, Cout]


def kpconv_reference(query_points, support_points, neighbors, x,
                     K_points, weight, point_influence):
    """Pure-JAX mirror of the PyTorch KPConv_ops (linear influence, sum mode)."""
    N, dim = query_points.shape
    Cin = x.shape[1]
    support_ext = jnp.concatenate(
        [support_points, jnp.full((1, dim), 1e6, support_points.dtype)], axis=0)
    feat_ext = jnp.concatenate([x, jnp.zeros((1, Cin), x.dtype)], axis=0)
    nbc = support_ext[neighbors] - query_points[:, None, :]           # [N, M, 3]
    nbf = feat_ext[neighbors]                                         # [N, M, Cin]
    diff = nbc[:, :, None, :] - K_points[None, None, :, :]            # [N, M, K, 3]
    sq = jnp.sum(diff * diff, axis=-1)                                # [N, M, K]
    infl = jnp.maximum(1.0 - jnp.sqrt(sq) / point_influence, 0.0)
    infl = jnp.transpose(infl, (0, 2, 1))                             # [N, K, M]
    weighted = jnp.matmul(infl, nbf, precision="highest")             # [N, K, Cin]
    return jnp.einsum("nkc,kco->no", weighted, weight, precision="highest")


def make_kernel_points(key, kernel_radius, n_kernel_points, dimension=3, fixed="center"):
    # TODO(synk): reference uses load_kernels (Lloyd-optimized kernel dispositions);
    # approximated here with deterministic points inside the kernel ball, center at 0.
    pts = jax.random.normal(key, (n_kernel_points, dimension), dtype=jnp.float32)
    pts = pts / (jnp.linalg.norm(pts, axis=1, keepdims=True) + 1e-9)
    pts = pts * (0.66 * kernel_radius)
    if fixed == "center":
        pts = pts.at[0].set(0.0)
    return pts.astype(jnp.float32)


def xavier_normal(key, shape):
    # torch.nn.init.xavier_normal_ on a [K, Cin, Cout] tensor:
    # fan_in = Cin * Cout, fan_out = K * Cout
    Kpts, Cin, Cout = shape
    fan_in = Cin * Cout
    fan_out = Kpts * Cout
    std = math.sqrt(2.0 / float(fan_in + fan_out))
    return std * jax.random.normal(key, shape, dtype=jnp.float32)


if __name__ == "__main__":
    key = jax.random.PRNGKey(0)
    k1, k2, k3, k4, k5, k6 = jax.random.split(key, 6)

    # Small shapes consistent with the module's forward signature; N chosen so
    # the grid has more than one tile (exercises index maps + padding).
    N, N0, M = 200, 150, 8        # queries, supports, neighbors per query
    Cin, Cout = 8, 16             # num_inputs, num_outputs
    Kpts, dim = 15, 3             # n_kernel_points, dimension
    point_influence = 0.3
    kernel_radius = 1.5 * point_influence   # _INFLUENCE_TO_RADIUS * point_influence

    query_points = jax.random.uniform(k1, (N, dim), dtype=jnp.float32)
    support_points = jax.random.uniform(k2, (N0, dim), dtype=jnp.float32)
    # index N0 acts as the shadow neighbor (maps to the 1e6 point / zero feature)
    neighbors = jax.random.randint(k3, (N, M), 0, N0 + 1, dtype=jnp.int32)
    x = jax.random.normal(k4, (N0, Cin), dtype=jnp.float32)

    K_points = make_kernel_points(k5, kernel_radius, Kpts, dim, fixed="center")
    weight = xavier_normal(k6, (Kpts, Cin, Cout))

    out = kpconv_forward(query_points, support_points, neighbors, x,
                         K_points, weight, point_influence)
    out = jax.block_until_ready(out)

    ref = kpconv_reference(query_points, support_points, neighbors, x,
                           K_points, weight, point_influence)
    assert out.shape == (N, Cout) and out.dtype == jnp.float32
    max_err = float(jnp.max(jnp.abs(out - ref)))
    assert jnp.allclose(out, ref, rtol=2e-2, atol=2e-2), f"max_err={max_err}"
    print("KERNEL_OK")
</pallas_src>

<mosaic_0001>
module attributes {stable_mosaic.version = 11 : i64} {
  func.func @_kpconv_kernel(%arg0: i32, %arg1: memref<3x8x128xf32, #tpu.memory_space<vmem>>, %arg2: memref<8x8x128xf32, #tpu.memory_space<vmem>>, %arg3: memref<16x120xf32, #tpu.memory_space<vmem>>, %arg4: memref<16x128xf32, #tpu.memory_space<vmem>>) attributes {dimension_semantics = [#tpu.dimension_semantics<parallel>], iteration_bounds = array<i64: 2>, scalar_prefetch = 0 : i64, scratch_operands = 0 : i64, tpu.core_type = #tpu.core_type<tc>, window_params = [{transform_indices = @transform_0, window_bounds = array<i64: 3, 8, 128>}, {transform_indices = @transform_1, window_bounds = array<i64: 8, 8, 128>}, {pipeline_mode = #tpu.pipeline_mode<synchronous>, transform_indices = @transform_2, window_bounds = array<i64: 16, 120>}, {transform_indices = @transform_3, window_bounds = array<i64: 16, 128>}]} {
    %c0 = arith.constant 0 : index
    %c0_0 = arith.constant 0 : index
    %c0_1 = arith.constant 0 : index
    %0 = vector.load %arg1[%c0, %c0_0, %c0_1] : memref<3x8x128xf32, #tpu.memory_space<vmem>>, vector<1x8x128xf32>
    %1 = vector.shape_cast %0 : vector<1x8x128xf32> to vector<8x128xf32>
    %c1 = arith.constant 1 : index
    %c0_2 = arith.constant 0 : index
    %c0_3 = arith.constant 0 : index
    %2 = vector.load %arg1[%c1, %c0_2, %c0_3] : memref<3x8x128xf32, #tpu.memory_space<vmem>>, vector<1x8x128xf32>
    %3 = vector.shape_cast %2 : vector<1x8x128xf32> to vector<8x128xf32>
    %c2 = arith.constant 2 : index
    %c0_4 = arith.constant 0 : index
    %c0_5 = arith.constant 0 : index
    %4 = vector.load %arg1[%c2, %c0_4, %c0_5] : memref<3x8x128xf32, #tpu.memory_space<vmem>>, vector<1x8x128xf32>
    %5 = vector.shape_cast %4 : vector<1x8x128xf32> to vector<8x128xf32>
    %c0_6 = arith.constant 0 : index
    %c0_7 = arith.constant 0 : index
    %c0_8 = arith.constant 0 : index
    %6 = vector.load %arg2[%c0_6, %c0_7, %c0_8] : memref<8x8x128xf32, #tpu.memory_space<vmem>>, vector<8x8x128xf32>
    %cst = arith.constant 0.000000e+00 : f32
    %7 = vector.broadcast %cst : f32 to vector<8x128xf32>
    %8 = arith.subf %1, %7 : vector<8x128xf32>
    %cst_9 = arith.constant 0.000000e+00 : f32
    %9 = vector.broadcast %cst_9 : f32 to vector<8x128xf32>
    %10 = arith.subf %3, %9 : vector<8x128xf32>
    %cst_10 = arith.constant 0.000000e+00 : f32
    %11 = vector.broadcast %cst_10 : f32 to vector<8x128xf32>
    %12 = arith.subf %5, %11 : vector<8x128xf32>
    %13 = arith.mulf %8, %8 : vector<8x128xf32>
    %14 = arith.mulf %10, %10 : vector<8x128xf32>
    %15 = arith.addf %13, %14 : vector<8x128xf32>
    %16 = arith.mulf %12, %12 : vector<8x128xf32>
    %17 = arith.addf %15, %16 : vector<8x128xf32>
    %18 = math.sqrt %17 : vector<8x128xf32>
    %cst_11 = arith.constant 3.33333325 : f32
    %19 = vector.broadcast %cst_11 : f32 to vector<8x128xf32>
    %20 = arith.mulf %18, %19 : vector<8x128xf32>
    %cst_12 = arith.constant 1.000000e+00 : f32
    %21 = vector.broadcast %cst_12 : f32 to vector<8x128xf32>
    %22 = arith.subf %21, %20 : vector<8x128xf32>
    %cst_13 = arith.constant 0.000000e+00 : f32
    %23 = vector.broadcast %cst_13 : f32 to vector<8x128xf32>
    %24 = arith.maximumf %22, %23 : vector<8x128xf32>
    %25 = vector.shape_cast %24 : vector<8x128xf32> to vector<1x8x128xf32>
    %26 = vector.broadcast %25 : vector<1x8x128xf32> to vector<8x8x128xf32>
    %27 = arith.mulf %26, %6 : vector<8x8x128xf32>
    %cst_14 = arith.constant dense<0.000000e+00> : vector<8x128xf32>
    %28 = vector.multi_reduction <add>, %27, %cst_14 [1] : vector<8x8x128xf32> to vector<8x128xf32>
    %cst_15 = arith.constant -0.0237090122 : f32
    %29 = vector.broadcast %cst_15 : f32 to vector<8x128xf32>
    %30 = arith.subf %1, %29 : vector<8x128xf32>
    %cst_16 = arith.constant -0.263264567 : f32
    %31 = vector.broadcast %cst_16 : f32 to vector<8x128xf32>
    %32 = arith.subf %3, %31 : vector<8x128xf32>
    %cst_17 = arith.constant -0.135420263 : f32
    %33 = vector.broadcast %cst_17 : f32 to vector<8x128xf32>
    %34 = arith.subf %5, %33 : vector<8x128xf32>
    %35 = arith.mulf %30, %30 : vector<8x128xf32>
    %36 = arith.mulf %32, %32 : vector<8x128xf32>
    %37 = arith.addf %35, %36 : vector<8x128xf32>
    %38 = arith.mulf %34, %34 : vector<8x128xf32>
    %39 = arith.addf %37, %38 : vector<8x128xf32>
    %40 = math.sqrt %39 : vector<8x128xf32>
    %cst_18 = arith.constant 3.33333325 : f32
    %41 = vector.broadcast %cst_18 : f32 to vector<8x128xf32>
    %42 = arith.mulf %40, %41 : vector<8x128xf32>
    %cst_19 = arith.constant 1.000000e+00 : f32
    %43 = vector.broadcast %cst_19 : f32 to vector<8x128xf32>
    %44 = arith.subf %43, %42 : vector<8x128xf32>
    %cst_20 = arith.constant 0.000000e+00 : f32
    %45 = vector.broadcast %cst_20 : f32 to vector<8x128xf32>
    %46 = arith.maximumf %44, %45 : vector<8x128xf32>
    %47 = vector.shape_cast %46 : vector<8x128xf32> to vector<1x8x128xf32>
    %48 = vector.broadcast %47 : vector<1x8x128xf32> to vector<8x8x128xf32>
    %49 = arith.mulf %48, %6 : vector<8x8x128xf32>
    %cst_21 = arith.constant dense<0.000000e+00> : vector<8x128xf32>
    %50 = vector.multi_reduction <add>, %49, %cst_21 [1] : vector<8x8x128xf32> to vector<8x128xf32>
    %cst_22 = arith.constant 0.123470761 : f32
    %51 = vector.broadcast %cst_22 : f32 to vector<8x128xf32>
    %52 = arith.subf %1, %51 : vector<8x128xf32>
    %cst_23 = arith.constant 0.262191862 : f32
    %53 = vector.broadcast %cst_23 : f32 to vector<8x128xf32>
    %54 = arith.subf %3, %53 : vector<8x128xf32>
    %cst_24 = arith.constant 0.0649569184 : f32
    %55 = vector.broadcast %cst_24 : f32 to vector<8x128xf32>
    %56 = arith.subf %5, %55 : vector<8x128xf32>
    %57 = arith.mulf %52, %52 : vector<8x128xf32>
    %58 = arith.mulf %54, %54 : vector<8x128xf32>
    %59 = arith.addf %57, %58 : vector<8x128xf32>
    %60 = arith.mulf %56, %56 : vector<8x128xf32>
    %61 = arith.addf %59, %60 : vector<8x128xf32>
    %62 = math.sqrt %61 : vector<8x128xf32>
    %cst_25 = arith.constant 3.33333325 : f32
    %63 = vector.broadcast %cst_25 : f32 to vector<8x128xf32>
    %64 = arith.mulf %62, %63 : vector<8x128xf32>
    %cst_26 = arith.constant 1.000000e+00 : f32
    %65 = vector.broadcast %cst_26 : f32 to vector<8x128xf32>
    %66 = arith.subf %65, %64 : vector<8x128xf32>
    %cst_27 = arith.constant 0.000000e+00 : f32
    %67 = vector.broadcast %cst_27 : f32 to vector<8x128xf32>
    %68 = arith.maximumf %66, %67 : vector<8x128xf32>
    %69 = vector.shape_cast %68 : vector<8x128xf32> to vector<1x8x128xf32>
    %70 = vector.broadcast %69 : vector<1x8x128xf32> to vector<8x8x128xf32>
    %71 = arith.mulf %70, %6 : vector<8x8x128xf32>
    %cst_28 = arith.constant dense<0.000000e+00> : vector<8x128xf32>
    %72 = vector.multi_reduction <add>, %71, %cst_28 [1] : vector<8x8x128xf32> to vector<8x128xf32>
    %cst_29 = arith.constant -0.0506366044 : f32
    %73 = vector.broadcast %cst_29 : f32 to vector<8x128xf32>
    %74 = arith.subf %1, %73 : vector<8x128xf32>
    %cst_30 = arith.constant -0.130559072 : f32
    %75 = vector.broadcast %cst_30 : f32 to vector<8x128xf32>
    %76 = arith.subf %3, %75 : vector<8x128xf32>
    %cst_31 = arith.constant -0.261914581 : f32
    %77 = vector.broadcast %cst_31 : f32 to vector<8x128xf32>
    %78 = arith.subf %5, %77 : vector<8x128xf32>
    %79 = arith.mulf %74, %74 : vector<8x128xf32>
    %80 = arith.mulf %76, %76 : vector<8x128xf32>
    %81 = arith.addf %79, %80 : vector<8x128xf32>
    %82 = arith.mulf %78, %78 : vector<8x128xf32>
    %83 = arith.addf %81, %82 : vector<8x128xf32>
    %84 = math.sqrt %83 : vector<8x128xf32>
    %cst_32 = arith.constant 3.33333325 : f32
    %85 = vector.broadcast %cst_32 : f32 to vector<8x128xf32>
    %86 = arith.mulf %84, %85 : vector<8x128xf32>
    %cst_33 = arith.constant 1.000000e+00 : f32
    %87 = vector.broadcast %cst_33 : f32 to vector<8x128xf32>
    %88 = arith.subf %87, %86 : vector<8x128xf32>
    %cst_34 = arith.constant 0.000000e+00 : f32
    %89 = vector.broadcast %cst_34 : f32 to vector<8x128xf32>
    %90 = arith.maximumf %88, %89 : vector<8x128xf32>
    %91 = vector.shape_cast %90 : vector<8x128xf32> to vector<1x8x128xf32>
    %92 = vector.broadcast %91 : vector<1x8x128xf32> to vector<8x8x128xf32>
    %93 = arith.mulf %92, %6 : vector<8x8x128xf32>
    %cst_35 = arith.constant dense<0.000000e+00> : vector<8x128xf32>
    %94 = vector.multi_reduction <add>, %93, %cst_35 [1] : vector<8x8x128xf32> to vector<8x128xf32>
    %cst_36 = arith.constant 0.173645347 : f32
    %95 = vector.broadcast %cst_36 : f32 to vector<8x128xf32>
    %96 = arith.subf %1, %95 : vector<8x128xf32>
    %cst_37 = arith.constant -0.103508368 : f32
    %97 = vector.broadcast %cst_37 : f32 to vector<8x128xf32>
    %98 = arith.subf %3, %97 : vector<8x128xf32>
    %cst_38 = arith.constant -0.217582852 : f32
    %99 = vector.broadcast %cst_38 : f32 to vector<8x128xf32>
    %100 = arith.subf %5, %99 : vector<8x128xf32>
    %101 = arith.mulf %96, %96 : vector<8x128xf32>
    %102 = arith.mulf %98, %98 : vector<8x128xf32>
    %103 = arith.addf %101, %102 : vector<8x128xf32>
    %104 = arith.mulf %100, %100 : vector<8x128xf32>
    %105 = arith.addf %103, %104 : vector<8x128xf32>
    %106 = math.sqrt %105 : vector<8x128xf32>
    %cst_39 = arith.constant 3.33333325 : f32
    %107 = vector.broadcast %cst_39 : f32 to vector<8x128xf32>
    %108 = arith.mulf %106, %107 : vector<8x128xf32>
    %cst_40 = arith.constant 1.000000e+00 : f32
    %109 = vector.broadcast %cst_40 : f32 to vector<8x128xf32>
    %110 = arith.subf %109, %108 : vector<8x128xf32>
    %cst_41 = arith.constant 0.000000e+00 : f32
    %111 = vector.broadcast %cst_41 : f32 to vector<8x128xf32>
    %112 = arith.maximumf %110, %111 : vector<8x128xf32>
    %113 = vector.shape_cast %112 : vector<8x128xf32> to vector<1x8x128xf32>
    %114 = vector.broadcast %113 : vector<1x8x128xf32> to vector<8x8x128xf32>
    %115 = arith.mulf %114, %6 : vector<8x8x128xf32>
    %cst_42 = arith.constant dense<0.000000e+00> : vector<8x128xf32>
    %116 = vector.multi_reduction <add>, %115, %cst_42 [1] : vector<8x8x128xf32> to vector<8x128xf32>
    %cst_43 = arith.constant 0.222502068 : f32
    %117 = vector.broadcast %cst_43 : f32 to vector<8x128xf32>
    %118 = arith.subf %1, %117 : vector<8x128xf32>
    %cst_44 = arith.constant 0.190678149 : f32
    %119 = vector.broadcast %cst_44 : f32 to vector<8x128xf32>
    %120 = arith.subf %3, %119 : vector<8x128xf32>
    %cst_45 = arith.constant 0.0484114327 : f32
    %121 = vector.broadcast %cst_45 : f32 to vector<8x128xf32>
    %122 = arith.subf %5, %121 : vector<8x128xf32>
    %123 = arith.mulf %118, %118 : vector<8x128xf32>
    %124 = arith.mulf %120, %120 : vector<8x128xf32>
    %125 = arith.addf %123, %124 : vector<8x128xf32>
    %126 = arith.mulf %122, %122 : vector<8x128xf32>
    %127 = arith.addf %125, %126 : vector<8x128xf32>
    %128 = math.sqrt %127 : vector<8x128xf32>
    %cst_46 = arith.constant 3.33333325 : f32
    %129 = vector.broadcast %cst_46 : f32 to vector<8x128xf32>
    %130 = arith.mulf %128, %129 : vector<8x128xf32>
    %cst_47 = arith.constant 1.000000e+00 : f32
    %131 = vector.broadcast %cst_47 : f32 to vector<8x128xf32>
    %132 = arith.subf %131, %130 : vector<8x128xf32>
    %cst_48 = arith.constant 0.000000e+00 : f32
    %133 = vector.broadcast %cst_48 : f32 to vector<8x128xf32>
    %134 = arith.maximumf %132, %133 : vector<8x128xf32>
    %135 = vector.shape_cast %134 : vector<8x128xf32> to vector<1x8x128xf32>
    %136 = vector.broadcast %135 : vector<1x8x128xf32> to vector<8x8x128xf32>
    %137 = arith.mulf %136, %6 : vector<8x8x128xf32>
    %cst_49 = arith.constant dense<0.000000e+00> : vector<8x128xf32>
    %138 = vector.multi_reduction <add>, %137, %cst_49 [1] : vector<8x8x128xf32> to vector<8x128xf32>
    %cst_50 = arith.constant 0.0383978598 : f32
    %139 = vector.broadcast %cst_50 : f32 to vector<8x128xf32>
    %140 = arith.subf %1, %139 : vector<8x128xf32>
    %cst_51 = arith.constant 0.0750817433 : f32
    %141 = vector.broadcast %cst_51 : f32 to vector<8x128xf32>
    %142 = arith.subf %3, %141 : vector<8x128xf32>
    %cst_52 = arith.constant -0.284775943 : f32
    %143 = vector.broadcast %cst_52 : f32 to vector<8x128xf32>
    %144 = arith.subf %5, %143 : vector<8x128xf32>
    %145 = arith.mulf %140, %140 : vector<8x128xf32>
    %146 = arith.mulf %142, %142 : vector<8x128xf32>
    %147 = arith.addf %145, %146 : vector<8x128xf32>
    %148 = arith.mulf %144, %144 : vector<8x128xf32>
    %149 = arith.addf %147, %148 : vector<8x128xf32>
    %150 = math.sqrt %149 : vector<8x128xf32>
    %cst_53 = arith.constant 3.33333325 : f32
    %151 = vector.broadcast %cst_53 : f32 to vector<8x128xf32>
    %152 = arith.mulf %150, %151 : vector<8x128xf32>
    %cst_54 = arith.constant 1.000000e+00 : f32
    %153 = vector.broadcast %cst_54 : f32 to vector<8x128xf32>
    %154 = arith.subf %153, %152 : vector<8x128xf32>
    %cst_55 = arith.constant 0.000000e+00 : f32
    %155 = vector.broadcast %cst_55 : f32 to vector<8x128xf32>
    %156 = arith.maximumf %154, %155 : vector<8x128xf32>
    %157 = vector.shape_cast %156 : vector<8x128xf32> to vector<1x8x128xf32>
    %158 = vector.broadcast %157 : vector<1x8x128xf32> to vector<8x8x128xf32>
    %159 = arith.mulf %158, %6 : vector<8x8x128xf32>
    %cst_56 = arith.constant dense<0.000000e+00> : vector<8x128xf32>
    %160 = vector.multi_reduction <add>, %159, %cst_56 [1] : vector<8x8x128xf32> to vector<8x128xf32>
    %cst_57 = arith.constant 0.00283990498 : f32
    %161 = vector.broadcast %cst_57 : f32 to vector<8x128xf32>
    %162 = arith.subf %1, %161 : vector<8x128xf32>
    %cst_58 = arith.constant -0.201007679 : f32
    %163 = vector.broadcast %cst_58 : f32 to vector<8x128xf32>
    %164 = arith.subf %3, %163 : vector<8x128xf32>
    %cst_59 = arith.constant 0.21862489 : f32
    %165 = vector.broadcast %cst_59 : f32 to vector<8x128xf32>
    %166 = arith.subf %5, %165 : vector<8x128xf32>
    %167 = arith.mulf %162, %162 : vector<8x128xf32>
    %168 = arith.mulf %164, %164 : vector<8x128xf32>
    %169 = arith.addf %167, %168 : vector<8x128xf32>
    %170 = arith.mulf %166, %166 : vector<8x128xf32>
    %171 = arith.addf %169, %170 : vector<8x128xf32>
    %172 = math.sqrt %171 : vector<8x128xf32>
    %cst_60 = arith.constant 3.33333325 : f32
    %173 = vector.broadcast %cst_60 : f32 to vector<8x128xf32>
    %174 = arith.mulf %172, %173 : vector<8x128xf32>
    %cst_61 = arith.constant 1.000000e+00 : f32
    %175 = vector.broadcast %cst_61 : f32 to vector<8x128xf32>
    %176 = arith.subf %175, %174 : vector<8x128xf32>
    %cst_62 = arith.constant 0.000000e+00 : f32
    %177 = vector.broadcast %cst_62 : f32 to vector<8x128xf32>
    %178 = arith.maximumf %176, %177 : vector<8x128xf32>
    %179 = vector.shape_cast %178 : vector<8x128xf32> to vector<1x8x128xf32>
    %180 = vector.broadcast %179 : vector<1x8x128xf32> to vector<8x8x128xf32>
    %181 = arith.mulf %180, %6 : vector<8x8x128xf32>
    %cst_63 = arith.constant dense<0.000000e+00> : vector<8x128xf32>
    %182 = vector.multi_reduction <add>, %181, %cst_63 [1] : vector<8x8x128xf32> to vector<8x128xf32>
    %cst_64 = arith.constant 0.160510793 : f32
    %183 = vector.broadcast %cst_64 : f32 to vector<8x128xf32>
    %184 = arith.subf %1, %183 : vector<8x128xf32>
    %cst_65 = arith.constant -0.014885447 : f32
    %185 = vector.broadcast %cst_65 : f32 to vector<8x128xf32>
    %186 = arith.subf %3, %185 : vector<8x128xf32>
    %cst_66 = arith.constant -0.249446794 : f32
    %187 = vector.broadcast %cst_66 : f32 to vector<8x128xf32>
    %188 = arith.subf %5, %187 : vector<8x128xf32>
    %189 = arith.mulf %184, %184 : vector<8x128xf32>
    %190 = arith.mulf %186, %186 : vector<8x128xf32>
    %191 = arith.addf %189, %190 : vector<8x128xf32>
    %192 = arith.mulf %188, %188 : vector<8x128xf32>
    %193 = arith.addf %191, %192 : vector<8x128xf32>
    %194 = math.sqrt %193 : vector<8x128xf32>
    %cst_67 = arith.constant 3.33333325 : f32
    %195 = vector.broadcast %cst_67 : f32 to vector<8x128xf32>
    %196 = arith.mulf %194, %195 : vector<8x128xf32>
    %cst_68 = arith.constant 1.000000e+00 : f32
    %197 = vector.broadcast %cst_68 : f32 to vector<8x128xf32>
    %198 = arith.subf %197, %196 : vector<8x128xf32>
    %cst_69 = arith.constant 0.000000e+00 : f32
    %199 = vector.broadcast %cst_69 : f32 to vector<8x128xf32>
    %200 = arith.maximumf %198, %199 : vector<8x128xf32>
    %201 = vector.shape_cast %200 : vector<8x128xf32> to vector<1x8x128xf32>
    %202 = vector.broadcast %201 : vector<1x8x128xf32> to vector<8x8x128xf32>
    %203 = arith.mulf %202, %6 : vector<8x8x128xf32>
    %cst_70 = arith.constant dense<0.000000e+00> : vector<8x128xf32>
    %204 = vector.multi_reduction <add>, %203, %cst_70 [1] : vector<8x8x128xf32> to vector<8x128xf32>
    %cst_71 = arith.constant -0.270567983 : f32
    %205 = vector.broadcast %cst_71 : f32 to vector<8x128xf32>
    %206 = arith.subf %1, %205 : vector<8x128xf32>
    %cst_72 = arith.constant 0.0293598436 : f32
    %207 = vector.broadcast %cst_72 : f32 to vector<8x128xf32>
    %208 = arith.subf %3, %207 : vector<8x128xf32>
    %cst_73 = arith.constant -0.118911631 : f32
    %209 = vector.broadcast %cst_73 : f32 to vector<8x128xf32>
    %210 = arith.subf %5, %209 : vector<8x128xf32>
    %211 = arith.mulf %206, %206 : vector<8x128xf32>
    %212 = arith.mulf %208, %208 : vector<8x128xf32>
    %213 = arith.addf %211, %212 : vector<8x128xf32>
    %214 = arith.mulf %210, %210 : vector<8x128xf32>
    %215 = arith.addf %213, %214 : vector<8x128xf32>
    %216 = math.sqrt %215 : vector<8x128xf32>
    %cst_74 = arith.constant 3.33333325 : f32
    %217 = vector.broadcast %cst_74 : f32 to vector<8x128xf32>
    %218 = arith.mulf %216, %217 : vector<8x128xf32>
    %cst_75 = arith.constant 1.000000e+00 : f32
    %219 = vector.broadcast %cst_75 : f32 to vector<8x128xf32>
    %220 = arith.subf %219, %218 : vector<8x128xf32>
    %cst_76 = arith.constant 0.000000e+00 : f32
    %221 = vector.broadcast %cst_76 : f32 to vector<8x128xf32>
    %222 = arith.maximumf %220, %221 : vector<8x128xf32>
    %223 = vector.shape_cast %222 : vector<8x128xf32> to vector<1x8x128xf32>
    %224 = vector.broadcast %223 : vector<1x8x128xf32> to vector<8x8x128xf32>
    %225 = arith.mulf %224, %6 : vector<8x8x128xf32>
    %cst_77 = arith.constant dense<0.000000e+00> : vector<8x128xf32>
    %226 = vector.multi_reduction <add>, %225, %cst_77 [1] : vector<8x8x128xf32> to vector<8x128xf32>
    %cst_78 = arith.constant -0.0237984359 : f32
    %227 = vector.broadcast %cst_78 : f32 to vector<8x128xf32>
    %228 = arith.subf %1, %227 : vector<8x128xf32>
    %cst_79 = arith.constant 0.209193558 : f32
    %229 = vector.broadcast %cst_79 : f32 to vector<8x128xf32>
    %230 = arith.subf %3, %229 : vector<8x128xf32>
    %cst_80 = arith.constant -0.209477186 : f32
    %231 = vector.broadcast %cst_80 : f32 to vector<8x128xf32>
    %232 = arith.subf %5, %231 : vector<8x128xf32>
    %233 = arith.mulf %228, %228 : vector<8x128xf32>
    %234 = arith.mulf %230, %230 : vector<8x128xf32>
    %235 = arith.addf %233, %234 : vector<8x128xf32>
    %236 = arith.mulf %232, %232 : vector<8x128xf32>
    %237 = arith.addf %235, %236 : vector<8x128xf32>
    %238 = math.sqrt %237 : vector<8x128xf32>
    %cst_81 = arith.constant 3.33333325 : f32
    %239 = vector.broadcast %cst_81 : f32 to vector<8x128xf32>
    %240 = arith.mulf %238, %239 : vector<8x128xf32>
    %cst_82 = arith.constant 1.000000e+00 : f32
    %241 = vector.broadcast %cst_82 : f32 to vector<8x128xf32>
    %242 = arith.subf %241, %240 : vector<8x128xf32>
    %cst_83 = arith.constant 0.000000e+00 : f32
    %243 = vector.broadcast %cst_83 : f32 to vector<8x128xf32>
    %244 = arith.maximumf %242, %243 : vector<8x128xf32>
    %245 = vector.shape_cast %244 : vector<8x128xf32> to vector<1x8x128xf32>
    %246 = vector.broadcast %245 : vector<1x8x128xf32> to vector<8x8x128xf32>
    %247 = arith.mulf %246, %6 : vector<8x8x128xf32>
    %cst_84 = arith.constant dense<0.000000e+00> : vector<8x128xf32>
    %248 = vector.multi_reduction <add>, %247, %cst_84 [1] : vector<8x8x128xf32> to vector<8x128xf32>
    %cst_85 = arith.constant -0.180621073 : f32
    %249 = vector.broadcast %cst_85 : f32 to vector<8x128xf32>
    %250 = arith.subf %1, %249 : vector<8x128xf32>
    %cst_86 = arith.constant -0.200019896 : f32
    %251 = vector.broadcast %cst_86 : f32 to vector<8x128xf32>
    %252 = arith.subf %3, %251 : vector<8x128xf32>
    %cst_87 = arith.constant -0.124808066 : f32
    %253 = vector.broadcast %cst_87 : f32 to vector<8x128xf32>
    %254 = arith.subf %5, %253 : vector<8x128xf32>
    %255 = arith.mulf %250, %250 : vector<8x128xf32>
    %256 = arith.mulf %252, %252 : vector<8x128xf32>
    %257 = arith.addf %255, %256 : vector<8x128xf32>
    %258 = arith.mulf %254, %254 : vector<8x128xf32>
    %259 = arith.addf %257, %258 : vector<8x128xf32>
    %260 = math.sqrt %259 : vector<8x128xf32>
    %cst_88 = arith.constant 3.33333325 : f32
    %261 = vector.broadcast %cst_88 : f32 to vector<8x128xf32>
    %262 = arith.mulf %260, %261 : vector<8x128xf32>
    %cst_89 = arith.constant 1.000000e+00 : f32
    %263 = vector.broadcast %cst_89 : f32 to vector<8x128xf32>
    %264 = arith.subf %263, %262 : vector<8x128xf32>
    %cst_90 = arith.constant 0.000000e+00 : f32
    %265 = vector.broadcast %cst_90 : f32 to vector<8x128xf32>
    %266 = arith.maximumf %264, %265 : vector<8x128xf32>
    %267 = vector.shape_cast %266 : vector<8x128xf32> to vector<1x8x128xf32>
    %268 = vector.broadcast %267 : vector<1x8x128xf32> to vector<8x8x128xf32>
    %269 = arith.mulf %268, %6 : vector<8x8x128xf32>
    %cst_91 = arith.constant dense<0.000000e+00> : vector<8x128xf32>
    %270 = vector.multi_reduction <add>, %269, %cst_91 [1] : vector<8x8x128xf32> to vector<8x128xf32>
    %cst_92 = arith.constant 0.264227301 : f32
    %271 = vector.broadcast %cst_92 : f32 to vector<8x128xf32>
    %272 = arith.subf %1, %271 : vector<8x128xf32>
    %cst_93 = arith.constant 0.0944110304 : f32
    %273 = vector.broadcast %cst_93 : f32 to vector<8x128xf32>
    %274 = arith.subf %3, %273 : vector<8x128xf32>
    %cst_94 = arith.constant -0.09736263 : f32
    %275 = vector.broadcast %cst_94 : f32 to vector<8x128xf32>
    %276 = arith.subf %5, %275 : vector<8x128xf32>
    %277 = arith.mulf %272, %272 : vector<8x128xf32>
    %278 = arith.mulf %274, %274 : vector<8x128xf32>
    %279 = arith.addf %277, %278 : vector<8x128xf32>
    %280 = arith.mulf %276, %276 : vector<8x128xf32>
    %281 = arith.addf %279, %280 : vector<8x128xf32>
    %282 = math.sqrt %281 : vector<8x128xf32>
    %cst_95 = arith.constant 3.33333325 : f32
    %283 = vector.broadcast %cst_95 : f32 to vector<8x128xf32>
    %284 = arith.mulf %282, %283 : vector<8x128xf32>
    %cst_96 = arith.constant 1.000000e+00 : f32
    %285 = vector.broadcast %cst_96 : f32 to vector<8x128xf32>
    %286 = arith.subf %285, %284 : vector<8x128xf32>
    %cst_97 = arith.constant 0.000000e+00 : f32
    %287 = vector.broadcast %cst_97 : f32 to vector<8x128xf32>
    %288 = arith.maximumf %286, %287 : vector<8x128xf32>
    %289 = vector.shape_cast %288 : vector<8x128xf32> to vector<1x8x128xf32>
    %290 = vector.broadcast %289 : vector<1x8x128xf32> to vector<8x8x128xf32>
    %291 = arith.mulf %290, %6 : vector<8x8x128xf32>
    %cst_98 = arith.constant dense<0.000000e+00> : vector<8x128xf32>
    %292 = vector.multi_reduction <add>, %291, %cst_98 [1] : vector<8x8x128xf32> to vector<8x128xf32>
    %cst_99 = arith.constant 0.108378135 : f32
    %293 = vector.broadcast %cst_99 : f32 to vector<8x128xf32>
    %294 = arith.subf %1, %293 : vector<8x128xf32>
    %cst_100 = arith.constant -0.103654541 : f32
    %295 = vector.broadcast %cst_100 : f32 to vector<8x128xf32>
    %296 = arith.subf %3, %295 : vector<8x128xf32>
    %cst_101 = arith.constant -2.563570e-01 : f32
    %297 = vector.broadcast %cst_101 : f32 to vector<8x128xf32>
    %298 = arith.subf %5, %297 : vector<8x128xf32>
    %299 = arith.mulf %294, %294 : vector<8x128xf32>
    %300 = arith.mulf %296, %296 : vector<8x128xf32>
    %301 = arith.addf %299, %300 : vector<8x128xf32>
    %302 = arith.mulf %298, %298 : vector<8x128xf32>
    %303 = arith.addf %301, %302 : vector<8x128xf32>
    %304 = math.sqrt %303 : vector<8x128xf32>
    %cst_102 = arith.constant 3.33333325 : f32
    %305 = vector.broadcast %cst_102 : f32 to vector<8x128xf32>
    %306 = arith.mulf %304, %305 : vector<8x128xf32>
    %cst_103 = arith.constant 1.000000e+00 : f32
    %307 = vector.broadcast %cst_103 : f32 to vector<8x128xf32>
    %308 = arith.subf %307, %306 : vector<8x128xf32>
    %cst_104 = arith.constant 0.000000e+00 : f32
    %309 = vector.broadcast %cst_104 : f32 to vector<8x128xf32>
    %310 = arith.maximumf %308, %309 : vector<8x128xf32>
    %311 = vector.shape_cast %310 : vector<8x128xf32> to vector<1x8x128xf32>
    %312 = vector.broadcast %311 : vector<1x8x128xf32> to vector<8x8x128xf32>
    %313 = arith.mulf %312, %6 : vector<8x8x128xf32>
    %cst_105 = arith.constant dense<0.000000e+00> : vector<8x128xf32>
    %314 = vector.multi_reduction <add>, %313, %cst_105 [1] : vector<8x8x128xf32> to vector<8x128xf32>
    %cst_106 = arith.constant 0.0178274252 : f32
    %315 = vector.broadcast %cst_106 : f32 to vector<8x128xf32>
    %316 = arith.subf %1, %315 : vector<8x128xf32>
    %cst_107 = arith.constant 0.277060062 : f32
    %317 = vector.broadcast %cst_107 : f32 to vector<8x128xf32>
    %318 = arith.subf %3, %317 : vector<8x128xf32>
    %cst_108 = arith.constant -0.105493546 : f32
    %319 = vector.broadcast %cst_108 : f32 to vector<8x128xf32>
    %320 = arith.subf %5, %319 : vector<8x128xf32>
    %321 = arith.mulf %316, %316 : vector<8x128xf32>
    %322 = arith.mulf %318, %318 : vector<8x128xf32>
    %323 = arith.addf %321, %322 : vector<8x128xf32>
    %324 = arith.mulf %320, %320 : vector<8x128xf32>
    %325 = arith.addf %323, %324 : vector<8x128xf32>
    %326 = math.sqrt %325 : vector<8x128xf32>
    %cst_109 = arith.constant 3.33333325 : f32
    %327 = vector.broadcast %cst_109 : f32 to vector<8x128xf32>
    %328 = arith.mulf %326, %327 : vector<8x128xf32>
    %cst_110 = arith.constant 1.000000e+00 : f32
    %329 = vector.broadcast %cst_110 : f32 to vector<8x128xf32>
    %330 = arith.subf %329, %328 : vector<8x128xf32>
    %cst_111 = arith.constant 0.000000e+00 : f32
    %331 = vector.broadcast %cst_111 : f32 to vector<8x128xf32>
    %332 = arith.maximumf %330, %331 : vector<8x128xf32>
    %333 = vector.shape_cast %332 : vector<8x128xf32> to vector<1x8x128xf32>
    %334 = vector.broadcast %333 : vector<1x8x128xf32> to vector<8x8x128xf32>
    %335 = arith.mulf %334, %6 : vector<8x8x128xf32>
    %cst_112 = arith.constant dense<0.000000e+00> : vector<8x128xf32>
    %336 = vector.multi_reduction <add>, %335, %cst_112 [1] : vector<8x8x128xf32> to vector<8x128xf32>
    %337 = tpu.concatenate %28, %50, %72, %94, %116, %138, %160, %182, %204, %226, %248, %270, %292, %314, %336 in 0 : vector<8x128xf32>, vector<8x128xf32>, vector<8x128xf32>, vector<8x128xf32>, vector<8x128xf32>, vector<8x128xf32>, vector<8x128xf32>, vector<8x128xf32>, vector<8x128xf32>, vector<8x128xf32>, vector<8x128xf32>, vector<8x128xf32>, vector<8x128xf32>, vector<8x128xf32>, vector<8x128xf32> -> vector<120x128xf32>
    %c0_113 = arith.constant 0 : index
    %c0_114 = arith.constant 0 : index
    %338 = vector.load %arg3[%c0_113, %c0_114] : memref<16x120xf32, #tpu.memory_space<vmem>>, vector<16x120xf32>
    %cst_115 = arith.constant dense<0.000000e+00> : vector<16x128xf32>
    %339 = tpu.matmul %338, %337, %cst_115 {dimension_numbers = #tpu.dot_dimension_numbers<[1], [0], [0], [1], [0, 0, 1, 1], [], []>} : vector<16x120xf32>, vector<120x128xf32>, vector<16x128xf32> -> vector<16x128xf32>
    %c0_116 = arith.constant 0 : index
    %c0_117 = arith.constant 0 : index
    %340 = vector.load %arg4[%c0_116, %c0_117] : memref<16x128xf32, #tpu.memory_space<vmem>>, vector<16x128xf32>
    tpu.vector_store %arg4[%c0_116, %c0_117], %339 {strides = array<i32>} : memref<16x128xf32, #tpu.memory_space<vmem>>, vector<16x128xf32>,
    return
  }
  func.func @transform_0(%arg0: i32) -> (i32, i32, i32) {
    %c0_i32 = arith.constant 0 : i32
    %c0_i32_0 = arith.constant 0 : i32
    %c0_i32_1 = arith.constant 0 : i32
    return %c0_i32, %c0_i32_0, %arg0 : i32, i32, i32
  }
  func.func @transform_1(%arg0: i32) -> (i32, i32, i32) {
    %c0_i32 = arith.constant 0 : i32
    %c0_i32_0 = arith.constant 0 : i32
    %c0_i32_1 = arith.constant 0 : i32
    return %c0_i32, %c0_i32_0, %arg0 : i32, i32, i32
  }
  func.func @transform_2(%arg0: i32) -> (i32, i32) {
    %c0_i32 = arith.constant 0 : i32
    %c0_i32_0 = arith.constant 0 : i32
    %c0_i32_1 = arith.constant 0 : i32
    return %c0_i32, %c0_i32_0 : i32, i32
  }
  func.func @transform_3(%arg0: i32) -> (i32, i32) {
    %c0_i32 = arith.constant 0 : i32
    %c0_i32_0 = arith.constant 0 : i32
    return %c0_i32, %arg0 : i32, i32
  }
}

</mosaic_0001>

<bundles_post_ra>
// kernel: tpu_custom_call.1
= control target key start
LH: loop header
LB: loop body
LE: loop exit
PB: predicated region body
PF: predicated region fallthrough
CT: control target
= control target key end

     0   :  { %s3265_s0 = inlined_call_operand.hbm [shape: f32[3,8,256], index: 0, kind: input, shape index: {}]   ;;  %s3266_s1 = inlined_call_operand.hbm [shape: f32[8,8,256], index: 1, kind: input, shape index: {}]   ;;  %s3267_s2 = inlined_call_operand.hbm [shape: f32[16,120], index: 2, kind: input, shape index: {}]   ;;  %s3268_s3 = inlined_call_operand.hbm [shape: f32[16,256], index: 3, kind: output, shape index: {}]  }
   0x1   :  { %3275 = sst [smem:[#allocation14_spill]] %s3265_s0 }
   0x2   :  { %3276 = sst [smem:[#allocation15_spill]] %s3267_s2 }
   0x3   :  { %8 = vsyncpa [#allocation3], 0 }
   0x4   :  { %10 = vsyncpa [#allocation3 + $0x1], 0 }
   0x5   :  { %11 = vsyncpa [#allocation6], 0 }
   0x6   :  { %13 = vsyncpa [#allocation6 + $0x1], 0 }
   0x7   :  { %14 = vsyncpa [#allocation4], 0 }
   0x8   :  { %16 = vsyncpa [#allocation4 + $0x1], 0  ;;  %s2264_s12 = smov 0   ;;  %s2266_s13 = smov 0  }
   0x9   :  { %s2268_s14 = smov 0   ;;  %s2270_s15 = smov 0  }
   0xa LB: > { %s2285_s16 = sadd.s32 4294967295, %s2232_s15   ;;  %s1812_s17 = sadd.s32 4294967294, %s2232_s15   ;;  %s2232_s15 = sphi %s2270_s15, %s3301_s15   ;;  %s2228_s14 = sphi %s2268_s14, %s3300_s14   ;;  %s2224_s13 = sphi %s2266_s13, %s3299_s13   ;;  %s2220_s12 = sphi %s2264_s12, %s3298_s12  }
   0xb   : > { %s2289_s18 = sadd.s32 1, %s2232_s15   ;;  %s29_s19 = sadd.s32 1, %s2228_s14 }
   0xc   : > { %s26_s20 = ssub.s32 %s2232_s15, %s2289_s18  ;;  %p36_p0 = scmp.ne.s32.totalorder %s2228_s14, %s2224_s13 }
   0xd   : > { %p27_p1 = scmp.eq.s32.totalorder %s26_s20, 0  ;;  %p37_p2 = scmp.eq.s32.totalorder %s2232_s15, 0 }
   0xe   : > { %p42_p3 = scmp.ne.s32.totalorder %s2224_s13, %s2220_s12  ;;  %p3269_p4 = scmp.eq.s32.totalorder %s2285_s16, 0 }
   0xf   : > { %s2301_s21 = scalar_select %p27_p1, %s2228_s14, %s29_s19  }
  0x10   : > { %p2303_p5 = por %p37_p2, %p36_p0  ;;  %p2309_p6 = por %p3269_p4, %p42_p3 }
  0x11   : > { %3277 = sst [smem:[#allocation13_spill]] %s2301_s21  ;;  %p113_p7 = scmp.eq.s32.totalorder %s2285_s16, 1 }
  0x12   : > { %s3278_s22 = scalar_select %p2303_p5, 1, 0 }
  0x13   : > { %s3279_s23 = scalar_select %p2309_p6, 1, 0 }
  0x14   : > { %p119_p8 = scmp.eq.s32.totalorder %s1812_s17, 1  ;;  %p1813_p9 = scmp.ge.s32.totalorder %s2232_s15, 1 }
  0x15   : > { %p126_p10 = scmp.lt.s32.totalorder %s2232_s15, 3  ;;  %p2316_p11 = por %p113_p7, %p36_p0 }
  0x16   : > { %p2320_p12 = por %p119_p8, %p42_p3  ;;  %s2234_s27 = smov [#allocation7]  }
  0x17   : > { %s3280_s24 = scalar_select %p2316_p11, 1, 0 }
  0x18   : > { %s3281_s25 = scalar_select %p2320_p12, 1, 0 }
  0x19   : > { %p2324_p13 = pnand %p1813_p9, %p126_p10  ;;  %s138_s28 = sshll.u32 %s2234_s27, 4  ;;  %s139_s28 = int_to_ptr.vmem [resolvable:$true] %s138_s28 }
  0x1a   : > { %s2339_s30 = sand.u32 1, %s2228_s14   ;;  %s3284_s2 = sld [smem:[#allocation15_spill]] }
  0x1b   : > { %s3282_s26 = scalar_select %p2324_p13, 1, 0 }
  0x1c   : > { %p1963_p1 = pneg %p2324_p13 }
  0x1e   : > { %p2332_p2 = pnand %p1963_p1, %p3269_p4 }
  0x20   : > { %s2070_s6 = scalar_lea.hbm %s3284_s2, 256  ;;  %p2072_p8 = pneg %p2332_p2 }
  0x21   : > { %p2071_p7 = scmp.ne.s32.totalorder %s3284_s2, %s2070_s6  ;;  %p2077_p1 = scmp.lt.u32.totalorder %s2070_s6, %s3284_s2 }
  0x23   : > { %p2073_p9 = pnand %p2072_p8, %p2071_p7 }
  0x25   : > { %p2074_p10 = pneg %p2073_p9 }
  0x27   : > { %p2079_p0 = pnand %p2077_p1, %p2074_p10 }
  0x29   : > { %2082 = shalt.err (!%p2079_p0)
}
  0x2a   : > { %s2083_s11 = scalar_lea.vmem %s139_s28, 256  ;;  %p2091_p11 = scmp.lt.s32.totalorder %s139_s28, %s139_s28 }
  0x2b   : > { %p2084_p4 = scmp.ne.s32.totalorder %s139_s28, %s2083_s11  ;;  %p2092_p6 = scmp.lt.s32.totalorder %s2083_s11, %s2083_s11 }
  0x2d   : > { %p2086_p3 = pnand %p2084_p4, %p2072_p8  ;;  %p2093_p13 = por %p2092_p6, %p2091_p11 }
  0x2f   : > { %p2087_p12 = pneg %p2086_p3 }
  0x31   : > { %p2094_p5 = pnand %p2093_p13, %p2087_p12 }
  0x33   : > { %2097 = shalt.err (!%p2094_p5)
}
  0x34   : > { %s3273_s17 = smov 128   ;;  %s2236_s19 = smov 8  }
  0x35   : > { %1966 = dma.hbm_to_vmem [thread:$0]  (!%p2332_p2), %s3284_s2, 256, %s139_s28, [#allocation6], %s3273_s17, %s3273_s17, %s2236_s19  }
  0x36   : > { %p3285_p4 = scmp.ne.s32.totalorder %s3278_s22, 0  ;;  %p3286_p6 = scmp.lt.s32.totalorder %s2232_s15, 2 }
  0x37   : > { %s1951_s5 = smul.u32 24, %s2339_s30  ;;  %s1816_s6 = sshll.u32 %s2232_s15, 7 }
  0x38   : > { %p2364_p11 = pnand %p3286_p6, %p3285_p4  ;;  %s3288_s0 = sld [smem:[#allocation14_spill]] }
  0x39   : > { %s156_s28 = scalar_lea.vmem [#allocation2], %s1951_s5  ;;  %s2380_s11 = scalar_lea.hbm %s3266_s1, %s1816_s6 }
  0x3a   : > { %s162_s22 = sshll.u32 %s156_s28, 4  ;;  %s153_s20 = scalar_lea.sflag [#allocation3], %s2339_s30  ;;  %s2375_s22 = int_to_ptr.vmem [resolvable:$true] %s162_s22 }
  0x3b   : > { %p2100_p12 = pneg %p2364_p11 }
  0x3e   : > { %s2373_s29 = scalar_lea.hbm %s3288_s0, %s1816_s6  ;;  %s2103_s5 = scalar_lea.hbm %s3288_s0, 768 }
  0x3f   : > { %s2098_s27 = scalar_lea.hbm %s2373_s29, 384  ;;  %p2104_p0 = scmp.lt.u32.totalorder %s2373_s29, %s3288_s0 }
  0x40   : > { %p2099_p5 = scmp.ne.s32.totalorder %s2373_s29, %s2098_s27  ;;  %p2105_p3 = scmp.lt.u32.totalorder %s2103_s5, %s2098_s27 }
  0x41   : > { %p2107_p8 = scmp.lt.u32.totalorder %s2098_s27, %s2373_s29 }
  0x42   : > { %p2101_p13 = pnand %p2100_p12, %p2099_p5  ;;  %p2106_p7 = por %p2105_p3, %p2104_p0 }
  0x44   : > { %p2102_p2 = pneg %p2101_p13  ;;  %p2108_p9 = por %p2107_p8, %p2106_p7 }
  0x46   : > { %p2109_p10 = pnand %p2108_p9, %p2102_p2 }
  0x48   : > { %2112 = shalt.err (!%p2109_p10)
}
  0x49   : > { %s2113_s6 = scalar_lea.vmem %s2375_s22, 384  ;;  %s2237_s9 = smov [#allocation2]  }
  0x4a   : > { %p2114_p1 = scmp.ne.s32.totalorder %s2375_s22, %s2113_s6  ;;  %s2118_s10 = sshll.u32 %s2237_s9, 4  ;;  %s2119_s10 = int_to_ptr.vmem [resolvable:$false] %s2118_s10 }
  0x4b   : > { %s2120_s17 = scalar_lea.vmem %s2119_s10, 768  ;;  %p2121_p5 = scmp.lt.s32.totalorder %s2375_s22, %s2119_s10 }
  0x4c   : > { %p2116_p4 = pnand %p2114_p1, %p2100_p12  ;;  %p2122_p13 = scmp.lt.s32.totalorder %s2120_s17, %s2113_s6 }
  0x4e   : > { %p2117_p6 = pneg %p2116_p4  ;;  %p2123_p0 = por %p2122_p13, %p2121_p5 }
  0x50   : > { %p2124_p3 = pnand %p2123_p0, %p2117_p6 }
  0x52   : > { %2127 = shalt.err (!%p2124_p3)
}
  0x53   : > { %s2238_s27 = smov 256   ;;  %s3289_s7 = smov 128  }
  0x54   : > { %1970 = dma.hbm_to_vmem [thread:$0]  (!%p2364_p11), %s2373_s29, 384, %s2375_s22, %s153_s20, %s2238_s27, %s3289_s7, %s2236_s19  }
  0x55   : > { %s172_s8 = sand.u32 1, %s2232_s15   ;;  %s1817_s5 = sshll.u32 %s2339_s30, 6 }
  0x56   : > { %s176_s28 = scalar_lea.vmem [#allocation5], %s1817_s5  ;;  %s2417_s9 = scalar_lea.sflag [#allocation6], %s172_s8 }
  0x57   : > { %s182_s6 = sshll.u32 %s176_s28, 4  ;;  %s2128_s10 = scalar_lea.hbm %s2380_s11, 1024  ;;  %s2415_s6 = int_to_ptr.vmem [resolvable:$true] %s182_s6 }
  0x58   : > { %p2129_p2 = scmp.ne.s32.totalorder %s2380_s11, %s2128_s10  ;;  %s2133_s2 = scalar_lea.hbm %s3266_s1, 2048 }
  0x59   : > { %p2134_p9 = scmp.lt.u32.totalorder %s2380_s11, %s3266_s1  ;;  %p2135_p10 = scmp.lt.u32.totalorder %s2133_s2, %s2128_s10 }
  0x5a   : > { %p2131_p7 = pnand %p2129_p2, %p2100_p12  ;;  %p2137_p4 = scmp.lt.u32.totalorder %s2128_s10, %s2380_s11 }
  0x5b   : > { %p2136_p1 = por %p2135_p10, %p2134_p9 }
  0x5c   : > { %p2132_p8 = pneg %p2131_p7 }
  0x5d   : > { %p2138_p6 = por %p2137_p4, %p2136_p1 }
  0x5f   : > { %p2139_p5 = pnand %p2138_p6, %p2132_p8 }
  0x61   : > { %2142 = shalt.err (!%p2139_p5)
}
  0x62   : > { %s2143_s30 = scalar_lea.vmem %s2415_s6, 1024  ;;  %s2239_s0 = smov [#allocation5]  }
  0x63   : > { %p2144_p13 = scmp.ne.s32.totalorder %s2415_s6, %s2143_s30  ;;  %s2148_s22 = sshll.u32 %s2239_s0, 4  ;;  %s2149_s22 = int_to_ptr.vmem [resolvable:$false] %s2148_s22 }
  0x64   : > { %s2150_s21 = scalar_lea.vmem %s2149_s22, 2048  ;;  %p2151_p2 = scmp.lt.s32.totalorder %s2415_s6, %s2149_s22 }
  0x65   : > { %p2146_p0 = pnand %p2144_p13, %p2100_p12  ;;  %p2152_p7 = scmp.lt.s32.totalorder %s2150_s21, %s2143_s30 }
  0x67   : > { %p2147_p3 = pneg %p2146_p0  ;;  %p2153_p9 = por %p2152_p7, %p2151_p2 }
  0x69   : > { %p2154_p10 = pnand %p2153_p9, %p2147_p3 }
  0x6b   : > { %2157 = shalt.err (!%p2154_p10)
}
  0x6c   : > { %1973 = dma.hbm_to_vmem [thread:$0]  (!%p2364_p11), %s2380_s11, 1024, %s2415_s6, %s2417_s9, %s2238_s27, %s3289_s7, %s2236_s19  }
  0x6d   : > { %p3290_p12 = scmp.ne.s32.totalorder %s3282_s26, 0 }
  0x6e   : > { %s2449_s2 = sand.u32 (!%p3290_p12), 1, %s2224_s13   ;;  %p3291_p8 = scmp.ne.s32.totalorder (!%p3290_p12), %s3279_s23, 0 }
  0x6f   : > { %194 = sbr.rel (%p3290_p12) target bundleno = 674 (0x2a2), region = 32  ;;  %s197_s8 = scalar_lea.sflag (!%p3290_p12), [#allocation3], %s2449_s2 }
  0x70   : > { %s1952_s20 = smul.u32 (!%p3290_p12), 24, %s2449_s2 }
  0x72   : > { %s2453_s5 = scalar_lea.vmem (!%p3290_p12), [#allocation2], %s1952_s20 }
  0x76   : > { %2203 = dma.done.wait (%p3291_p8), %s197_s8, 384  }
  0x77   : > { %2205 = vsyncadd (%p3291_p8), %s197_s8, 4294966912  ;;  %s205_s26 = sand.u32 1, %s2285_s16   ;;  %s1820_s19 = sshll.u32 %s2449_s2, 6 }
  0x78   : > { %s206_s4 = scalar_lea.sflag [#allocation6], %s205_s26  ;;  %s2461_s11 = scalar_lea.vmem [#allocation5], %s1820_s19 }
  0x79   : > { %2207 = dma.done.wait (%p3291_p8), %s206_s4, 1024  }
  0x7a   : > { %2209 = vsyncadd (%p3291_p8), %s206_s4, 4294966272  ;;  %p3292_p11 = scmp.eq.s32.totalorder %s2285_s16, 0 }
  0x7c   : > { %2211 = dma.done.wait (%p3292_p11), [#allocation6], 256   ;;  %p3293_p1 = pmov %p3292_p11 }
  0x7d   : > { %v241_v0 = vld [vmem:[%s2453_s5] sm:$0xff]  ;;  %v1823_v1 = vld [vmem:[%s2453_s5 + $0x8] sm:$0xff]  ;;  %v2474_v2 = vld [vmem:[%s2453_s5 + $0x10] sm:$0xff]  ;;  %vm1369_vm6 = vcmask 1041409   ;;  %vm1371_vm8 = vcmask 1042434   ;;  %vm1373_vm10 = vcmask 1043459  }
  0x7e   : > { %2213 = vsyncadd (%p3293_p1), [#allocation6], 4294967040  ;;  %v254_v3 = vmul.f32 %v241_v0, %v241_v0  ;;  %v255_v4 = vmul.f32 %v1823_v1, %v1823_v1  ;;  %v257_v5 = vmul.f32 %v2474_v2, %v2474_v2  ;;  %v1825_v6 = vadd.f32 0.023709012, %v241_v0  ;;  %s1822_s23 = sshll.u32 %s2449_s2, 4  ;;  %s1870_s28 = sshll.u32 %s2285_s16, 7 }
  0x7f   : > { %v1826_v7 = vadd.f32 0.26326457, %v1823_v1  ;;  %v1827_v9 = vadd.f32 0.13542026, %v2474_v2  ;;  %v1828_v11 = vadd.f32 -0.12347076, %v241_v0  ;;  %s3221_s10 = scalar_lea.hbm %s3268_s3, %s1870_s28 }
  0x80   : > { %v256_v8 = vadd.f32 %v255_v4, %v254_v3  ;;  %v328_v10 = vmul.f32 %v1825_v6, %v1825_v6  ;;  %v1829_v13 = vadd.f32 -0.26219186, %v1823_v1  ;;  %v1830_v14 = vadd.f32 -0.06495692, %v2474_v2  ;;  %s240_s27 = scalar_lea.vmem [#allocation8], %s1822_s23  ;;  %s1695_s17 = scalar_lea.sflag [#allocation4], %s2449_s2 }
  0x81   : > { %v329_v12 = vmul.f32 %v1826_v7, %v1826_v7  ;;  %v1831_v15 = vadd.f32 0.050636604, %v241_v0  ;;  %v331_v17 = vmul.f32 %v1827_v9, %v1827_v9  ;;  %v402_v18 = vmul.f32 %v1828_v11, %v1828_v11  ;;  %v2516_v11 = vld [vmem:[%s2461_s11 + $0x8] sm:$0xff]  ;;  %s1707_s7 = sshll.u32 %s240_s27, 4  ;;  %p3294_p6 = scmp.ne.s32.totalorder %s3280_s24, 0  ;;  %s3216_s7 = int_to_ptr.vmem [resolvable:$true] %s1707_s7 }
  0x82   : > { %v258_v16 = vadd.f32 %v257_v5, %v256_v8  ;;  %v1832_v19 = vadd.f32 0.13055907, %v1823_v1  ;;  %v403_v21 = vmul.f32 %v1829_v13, %v1829_v13  ;;  %v1833_v22 = vadd.f32 0.26191458, %v2474_v2  ;;  %s2158_s29 = scalar_lea.vmem %s3216_s7, 256  ;;  %s2240_s16 = smov [#allocation8]  }
  0x83   : > { %v330_v20 = vadd.f32 %v329_v12, %v328_v10  ;;  %v405_v23 = vmul.f32 %v1830_v14, %v1830_v14  ;;  %v476_v26 = vmul.f32 %v1831_v15, %v1831_v15  ;;  %v1834_v28 = vadd.f32 -0.17364535, %v241_v0  ;;  %v2513_v10 = vld [vmem:[%s2461_s11] sm:$0xff]  ;;  %v2519_v12 = vld [vmem:[%s2461_s11 + $0x10] sm:$0xff]  ;;  %p2159_p4 = scmp.ne.s32.totalorder %s3216_s7, %s2158_s29  ;;  %s2162_s30 = sshll.u32 %s2240_s16, 4  ;;  %s2163_s30 = int_to_ptr.vmem [resolvable:$false] %s2162_s30 }
  0x84   : > { %2021 = vrsqrt.f32 %v258_v16  ;;  %v404_v25 = vadd.f32 %v403_v21, %v402_v18  ;;  %v477_v27 = vmul.f32 %v1832_v19, %v1832_v19  ;;  %v1835_v29 = vadd.f32 0.10350837, %v1823_v1  ;;  %v2528_v18 = vld [vmem:[%s2461_s11 + $0x20] sm:$0xff]  ;;  %s2164_s0 = scalar_lea.vmem %s2163_s30, 512  ;;  %p2165_p0 = scmp.lt.s32.totalorder %s3216_s7, %s2163_s30 }
  0x85   : > { %v2481_v24 = vadd.f32 %v331_v17, %v330_v20  ;;  %v479_v30 = vmul.f32 %v1833_v22, %v1833_v22  ;;  %v1836_v31 = vadd.f32 0.21758285, %v2474_v2  ;;  %v550_v34 = vmul.f32 %v1834_v28, %v1834_v28  ;;  %v2525_v17 = vld [vmem:[%s2461_s11 + $0x18] sm:$0xff]  ;;  %p2160_p5 = pnand %p2159_p4, %p3294_p6  ;;  %p2166_p3 = scmp.lt.s32.totalorder %s2164_s0, %s2158_s29 }
  0x86   : > { %v2485_v32 = vadd.f32 %v405_v23, %v404_v25  ;;  %v478_v33 = vadd.f32 %v477_v27, %v476_v26  ;;  %v551_v35 = vmul.f32 %v1835_v29, %v1835_v29  ;;  %v1837_v36 = vadd.f32 -0.22250207, %v241_v0  ;;  %v2536_v23 = vld [vmem:[%s2461_s11 + $0x28] sm:$0xff]  ;;  %v2542_v25 = vld [vmem:[%s2461_s11 + $0x38] sm:$0xff] }
  0x87   : > { %2023 = vrsqrt.f32 %v2481_v24  ;;  %v1838_v37 = vadd.f32 -0.19067815, %v1823_v1  ;;  %v1839_v38 = vadd.f32 -0.048411433, %v2474_v2  ;;  %v553_v40 = vmul.f32 %v1836_v31, %v1836_v31  ;;  %p2161_p13 = pneg %p2160_p5  ;;  %p2167_p2 = por %p2166_p3, %p2165_p0 }
  0x88   : > { %2025 = vrsqrt.f32 %v2485_v32  ;;  %v2489_v39 = vadd.f32 %v479_v30, %v478_v33  ;;  %v624_v41 = vmul.f32 %v1837_v36, %v1837_v36  ;;  %v552_v43 = vadd.f32 %v551_v35, %v550_v34 }
  0x89   : > { %v625_v42 = vmul.f32 %v1838_v37, %v1838_v37  ;;  %v1840_v44 = vadd.f32 -0.03839786, %v241_v0  ;;  %v1841_v45 = vadd.f32 -0.07508174, %v1823_v1  ;;  %v1842_v46 = vadd.f32 0.28477594, %v2474_v2  ;;  %p2168_p7 = pnand %p2167_p2, %p2161_p13 }
  0x8a   : > { %vm261_vm0 = vcmp.eq.f32.partialorder %v258_v16, inf  ;;  %vm263_vm1 = vcmp.eq.f32.partialorder %v258_v16, 0.0  ;;  %2027 = vrsqrt.f32 %v2489_v39  ;;  %v627_v47 = vmul.f32 %v1839_v38, %v1839_v38 }
  0x8b   : > { %v264_v49 = vand.u32 2147483648, %v258_v16  ;;  %v626_v50 = vadd.f32 %v625_v42, %v624_v41  ;;  %v698_v51 = vmul.f32 %v1840_v44, %v1840_v44  ;;  %v699_v52 = vmul.f32 %v1841_v45, %v1841_v45 }
  0x8c   : > { %vm335_vm2 = vcmp.eq.f32.partialorder %v2481_v24, inf  ;;  %v1843_v54 = vadd.f32 -0.002839905, %v241_v0  ;;  %v1844_v55 = vadd.f32 0.20100768, %v1823_v1  ;;  %vm337_vm3 = vcmp.eq.f32.partialorder %v2481_v24, 0.0 }
  0x8d   : > { %v338_v56 = vand.u32 2147483648, %v2481_v24  ;;  %v2496_v57 = vadd.f32 %v553_v40, %v552_v43  ;;  %v701_v58 = vmul.f32 %v1842_v46, %v1842_v46  ;;  %v2499_v61 = vadd.f32 %v627_v47, %v626_v50 }
  0x8e   : > { %v2022_v48 = vpop.eup %2021  ;;  %v700_v62 = vadd.f32 %v699_v52, %v698_v51  ;;  %v1845_v63 = vadd.f32 -0.21862489, %v2474_v2  ;;  %v772_v3 = vmul.f32 %v1843_v54, %v1843_v54  ;;  %v773_v4 = vmul.f32 %v1844_v55, %v1844_v55 }
  0x8f   : > { %v260_v53 = vmul.f32 %v2022_v48, %v258_v16  ;;  %vm409_vm4 = vcmp.eq.f32.partialorder %v2485_v32, inf  ;;  %v412_v6 = vand.u32 2147483648, %v2485_v32  ;;  %2029 = vrsqrt.f32 %v2496_v57 }
  0x90   : > { %v2510_v2 = vadd.f32 %v701_v58, %v700_v62  ;;  %v774_v9 = vadd.f32 %v773_v4, %v772_v3  ;;  %v486_v20 = vand.u32 2147483648, %v2489_v39  ;;  %v560_v21 = vand.u32 2147483648, %v2496_v57 }
  0x91   : > { %v2024_v59 = vpop.eup %2023  ;;  %v262_v60 = vsel %vm261_vm0, %v258_v16, %v260_v53  ;;  %v775_v16 = vmul.f32 %v1845_v63, %v1845_v63  ;;  %2031 = vrsqrt.f32 %v2499_v61  ;;  %v634_v28 = vand.u32 2147483648, %v2499_v61 }
  0x92   : > { %v265_v0 = vsel %vm263_vm1, %v264_v49, %v262_v60  ;;  %v334_v1 = vmul.f32 %v2024_v59, %v2481_v24  ;;  %v2026_v7 = vpop.eup %2025  ;;  %2033 = vrsqrt.f32 %v2510_v2  ;;  %v708_v31 = vand.u32 2147483648, %v2510_v2 }
  0x93   : > { %v266_v5 = vmul.f32 3.3333333, %v265_v0  ;;  %v408_v15 = vmul.f32 %v2026_v7, %v2485_v32  ;;  %v2556_v33 = vadd.f32 %v775_v16, %v774_v9  ;;  %vm411_vm5 = vcmp.eq.f32.partialorder %v2485_v32, 0.0 }
  0x94   : > { %v336_v8 = vsel %vm335_vm2, %v2481_v24, %v334_v1  ;;  %v2028_v22 = vpop.eup %2027  ;;  %v2539_v24 = vld [vmem:[%s2461_s11 + $0x30] sm:$0xff]  ;;  %vm483_vm7 = vcmp.eq.f32.partialorder %v2489_v39, inf  ;;  %vm485_vm9 = vcmp.eq.f32.partialorder %v2489_v39, 0.0  ;;  %vm1375_vm11 = vcmask 1044484  }
  0x95   : > { %v267_v13 = vsub.f32 1.0, %v266_v5  ;;  %v339_v14 = vsel %vm337_vm3, %v338_v56, %v336_v8  ;;  %v2547_v27 = vsel %vm409_vm4, %v2485_v32, %v408_v15  ;;  %v2553_v30 = vmul.f32 %v2028_v22, %v2489_v39 }
  0x96   : > { %v2530_v19 = vmul.f32 3.3333333, %v339_v14  ;;  %vm557_vm12 = vcmp.eq.f32.partialorder %v2496_v57, inf  ;;  %vm1377_vm13 = vcmask 1045509   ;;  %vm631_vm14 = vcmp.eq.f32.partialorder %v2499_v61, inf }
  0x97   : > { %v268_v26 = vmax.f32 %v267_v13, 0.0  ;;  %vm1379_vm15 = vcmask 1046534   ;;  %vm559_vm0 = vcmp.eq.f32.partialorder %v2496_v57, 0.0  ;;  %vm1381_vm1 = vcmask 1047559  }
  0x98   : > { %v341_v29 = vsub.f32 1.0, %v2530_v19  ;;  %vm633_vm2 = vcmp.eq.f32.partialorder %v2499_v61, 0.0  ;;  %2035 = vrsqrt.f32 %v2556_v33  ;;  %vm705_vm3 = vcmp.eq.f32.partialorder %v2510_v2, inf }
  0x99   : > { %v269_v34 = vmul.f32 %v268_v26, %v2513_v10  ;;  %v270_v35 = vmul.f32 %v268_v26, %v2516_v11  ;;  %v271_v36 = vmul.f32 %v268_v26, %v2519_v12  ;;  %v272_v37 = vmul.f32 %v268_v26, %v2525_v17  ;;  %v2030_v55 = vpop.eup %2029 }
  0x9a   : > { %v273_v38 = vmul.f32 %v268_v26, %v2528_v18  ;;  %v274_v40 = vmul.f32 %v268_v26, %v2536_v23  ;;  %v275_v41 = vmul.f32 %v268_v26, %v2539_v24  ;;  %v276_v42 = vmul.f32 %v268_v26, %v2542_v25 }
  0x9b   : > { %v277_v43 = vrot.slane %v269_v34, 4  ;;  %v283_v44 = vrot.slane %v270_v35, 4  ;;  %v289_v45 = vrot.slane %v271_v36, 4  ;;  %v295_v46 = vrot.slane %v272_v37, 4  ;;  %v2032_v3 = vpop.eup %2031 }
  0x9c   : > { %v301_v47 = vrot.slane %v273_v38, 4  ;;  %v307_v48 = vrot.slane %v274_v40, 4  ;;  %v313_v49 = vrot.slane %v275_v41, 4  ;;  %v319_v50 = vrot.slane %v276_v42, 4  ;;  %v2569_v9 = vpop.eup %2033 }
  0x9d   : > { %v278_v51 = vadd.f32 %v277_v43, %v269_v34  ;;  %v284_v52 = vadd.f32 %v283_v44, %v270_v35  ;;  %v290_v53 = vadd.f32 %v289_v45, %v271_v36  ;;  %v296_v54 = vadd.f32 %v295_v46, %v272_v37 }
  0x9e   : > { %v302_v56 = vadd.f32 %v301_v47, %v273_v38  ;;  %v308_v58 = vadd.f32 %v307_v48, %v274_v40  ;;  %v314_v59 = vadd.f32 %v313_v49, %v275_v41  ;;  %v320_v60 = vadd.f32 %v319_v50, %v276_v42 }
  0x9f   : > { %v279_v62 = vrot.slane %v278_v51, 2  ;;  %v285_v63 = vrot.slane %v284_v52, 2  ;;  %v291_v0 = vrot.slane %v290_v53, 2  ;;  %v297_v1 = vrot.slane %v296_v54, 2 }
  0xa0   : > { %v303_v4 = vrot.slane %v302_v56, 2  ;;  %v309_v5 = vrot.slane %v308_v58, 2  ;;  %v315_v7 = vrot.slane %v314_v59, 2  ;;  %v321_v8 = vrot.slane %v320_v60, 2 }
  0xa1   : > { %v280_v13 = vadd.f32 %v279_v62, %v278_v51  ;;  %v286_v14 = vadd.f32 %v285_v63, %v284_v52  ;;  %v292_v15 = vadd.f32 %v291_v0, %v290_v53  ;;  %v298_v16 = vadd.f32 %v297_v1, %v296_v54 }
  0xa2   : > { %v304_v22 = vadd.f32 %v303_v4, %v302_v56  ;;  %v310_v26 = vadd.f32 %v309_v5, %v308_v58  ;;  %v316_v34 = vadd.f32 %v315_v7, %v314_v59  ;;  %v2571_v35 = vadd.f32 %v321_v8, %v320_v60 }
  0xa3   : > { %v281_v36 = vrot.slane %v280_v13, 1  ;;  %v287_v37 = vrot.slane %v286_v14, 1  ;;  %v293_v38 = vrot.slane %v292_v15, 1  ;;  %v299_v40 = vrot.slane %v298_v16, 1 }
  0xa4   : > { %v305_v41 = vrot.slane %v304_v22, 1  ;;  %v311_v42 = vrot.slane %v310_v26, 1  ;;  %v317_v43 = vrot.slane %v316_v34, 1  ;;  %v413_v44 = vsel %vm411_vm5, %v412_v6, %v2547_v27 }
  0xa5   : > { %v282_v45 = vadd.f32 %v281_v36, %v280_v13  ;;  %v288_v46 = vadd.f32 %v287_v37, %v286_v14  ;;  %v294_v47 = vadd.f32 %v293_v38, %v292_v15  ;;  %v323_v48 = vrot.slane %v2571_v35, 1 }
  0xa6   : > { %v2579_v49 = vadd.f32 %v299_v40, %v298_v16  ;;  %v2581_v50 = vadd.f32 %v305_v41, %v304_v22  ;;  %v2583_v51 = vadd.f32 %v311_v42, %v310_v26  ;;  %v2585_v52 = vadd.f32 %v317_v43, %v316_v34 }
  0xa7   : > { %v342_v53 = vmax.f32 %v341_v29, 0.0  ;;  %v1370_v54 = vsel %vm1369_vm6, %v288_v46, %v282_v45  ;;  %v2590_v32 = vmul.f32 3.3333333, %v413_v44  ;;  %v484_v6 = vsel %vm483_vm7, %v2489_v39, %v2553_v30 }
  0xa8   : > { %v2597_v27 = vsel %vm1371_vm8, %v294_v47, %v1370_v54  ;;  %v2603_v56 = vsel %vm485_vm9, %v486_v20, %v484_v6  ;;  %v2606_v19 = vmul.f32 %v2030_v55, %v2496_v57  ;;  %v2609_v29 = vmul.f32 %v2032_v3, %v2499_v61 }
  0xa9   : > { %v343_v58 = vmul.f32 %v342_v53, %v2513_v10  ;;  %v344_v59 = vmul.f32 %v342_v53, %v2516_v11  ;;  %v345_v30 = vmul.f32 %v342_v53, %v2519_v12  ;;  %v346_v60 = vmul.f32 %v342_v53, %v2525_v17 }
  0xaa   : > { %v347_v62 = vmul.f32 %v342_v53, %v2528_v18  ;;  %v348_v39 = vmul.f32 %v342_v53, %v2536_v23  ;;  %v349_v20 = vmul.f32 %v342_v53, %v2539_v24  ;;  %v350_v55 = vmul.f32 %v342_v53, %v2542_v25 }
  0xab   : > { %v351_v63 = vrot.slane %v343_v58, 4  ;;  %v357_v0 = vrot.slane %v344_v59, 4  ;;  %v363_v1 = vrot.slane %v345_v30, 4  ;;  %v369_v3 = vrot.slane %v346_v60, 4 }
  0xac   : > { %v375_v4 = vrot.slane %v347_v62, 4  ;;  %v381_v5 = vrot.slane %v348_v39, 4  ;;  %v387_v7 = vrot.slane %v349_v20, 4  ;;  %v393_v8 = vrot.slane %v350_v55, 4 }
  0xad   : > { %v352_v13 = vadd.f32 %v351_v63, %v343_v58  ;;  %v358_v14 = vadd.f32 %v357_v0, %v344_v59  ;;  %v364_v15 = vadd.f32 %v363_v1, %v345_v30  ;;  %v370_v16 = vadd.f32 %v369_v3, %v346_v60 }
  0xae   : > { %v376_v22 = vadd.f32 %v375_v4, %v347_v62  ;;  %v382_v26 = vadd.f32 %v381_v5, %v348_v39  ;;  %v388_v34 = vadd.f32 %v387_v7, %v349_v20  ;;  %v394_v36 = vadd.f32 %v393_v8, %v350_v55 }
  0xaf   : > { %v353_v37 = vrot.slane %v352_v13, 2  ;;  %v359_v38 = vrot.slane %v358_v14, 2  ;;  %v365_v40 = vrot.slane %v364_v15, 2  ;;  %v371_v41 = vrot.slane %v370_v16, 2 }
  0xb0   : > { %v377_v42 = vrot.slane %v376_v22, 2  ;;  %v383_v43 = vrot.slane %v382_v26, 2  ;;  %v389_v44 = vrot.slane %v388_v34, 2  ;;  %v395_v45 = vrot.slane %v394_v36, 2 }
  0xb1   : > { %v354_v46 = vadd.f32 %v353_v37, %v352_v13  ;;  %v360_v47 = vadd.f32 %v359_v38, %v358_v14  ;;  %v366_v53 = vadd.f32 %v365_v40, %v364_v15  ;;  %v372_v54 = vadd.f32 %v371_v41, %v370_v16 }
  0xb2   : > { %v378_v6 = vadd.f32 %v377_v42, %v376_v22  ;;  %v384_v58 = vadd.f32 %v383_v43, %v382_v26  ;;  %v390_v59 = vadd.f32 %v389_v44, %v388_v34  ;;  %v396_v30 = vadd.f32 %v395_v45, %v394_v36 }
  0xb3   : > { %v355_v60 = vrot.slane %v354_v46, 1  ;;  %v361_v62 = vrot.slane %v360_v47, 1  ;;  %v367_v39 = vrot.slane %v366_v53, 1  ;;  %v373_v20 = vrot.slane %v372_v54, 1 }
  0xb4   : > { %v379_v55 = vrot.slane %v378_v6, 1  ;;  %v385_v63 = vrot.slane %v384_v58, 1  ;;  %v391_v0 = vrot.slane %v390_v59, 1  ;;  %v397_v1 = vrot.slane %v396_v30, 1 }
  0xb5   : > { %v356_v3 = vadd.f32 %v355_v60, %v354_v46  ;;  %v362_v4 = vadd.f32 %v361_v62, %v360_v47  ;;  %v368_v5 = vadd.f32 %v367_v39, %v366_v53  ;;  %v374_v7 = vadd.f32 %v373_v20, %v372_v54 }
  0xb6   : > { %v324_v8 = vadd.f32 %v323_v48, %v2571_v35  ;;  %v380_v13 = vadd.f32 %v379_v55, %v378_v6  ;;  %v386_v14 = vadd.f32 %v385_v63, %v384_v58  ;;  %v392_v15 = vadd.f32 %v391_v0, %v390_v59 }
  0xb7   : > { %v1374_v16 = vsel %vm1373_vm10, %v2579_v49, %v2597_v27  ;;  %v1392_v22 = vsel %vm1369_vm6, %v362_v4, %v356_v3  ;;  %v415_v26 = vsub.f32 1.0, %v2590_v32  ;;  %v2631_v34 = vmul.f32 3.3333333, %v2603_v56 }
  0xb8   : > { %v398_v36 = vadd.f32 %v397_v1, %v396_v30  ;;  %v1376_v37 = vsel %vm1375_vm11, %v2581_v50, %v1374_v16  ;;  %v1393_v35 = vsel %vm1371_vm8, %v368_v5, %v1392_v22  ;;  %v558_v48 = vsel %vm557_vm12, %v2496_v57, %v2606_v19 }
  0xb9   : > { %v1378_v49 = vsel %vm1377_vm13, %v2583_v51, %v1376_v37  ;;  %v1394_v27 = vsel %vm1373_vm10, %v374_v7, %v1393_v35  ;;  %v416_v32 = vmax.f32 %v415_v26, 0.0  ;;  %v2647_v56 = vsel %vm631_vm14, %v2499_v61, %v2609_v29 }
  0xba   : > { %v1380_v50 = vsel %vm1379_vm15, %v2585_v52, %v1378_v49  ;;  %v1395_v38 = vsel %vm1375_vm11, %v380_v13, %v1394_v27  ;;  %v489_v40 = vsub.f32 1.0, %v2631_v34  ;;  %v2657_v51 = vsel %vm559_vm0, %v560_v21, %v558_v48 }
  0xbb   : > { %v1382_v19 = vsel %vm1381_vm1, %v324_v8, %v1380_v50  ;;  %v1396_v41 = vsel %vm1377_vm13, %v386_v14, %v1395_v38  ;;  %v417_v29 = vmul.f32 %v416_v32, %v2513_v10  ;;  %v418_v42 = vmul.f32 %v416_v32, %v2516_v11 }
  0xbc   : > { %v1397_v52 = vsel %vm1379_vm15, %v392_v15, %v1396_v41  ;;  %v419_v43 = vmul.f32 %v416_v32, %v2519_v12  ;;  %v420_v44 = vmul.f32 %v416_v32, %v2525_v17  ;;  %v421_v45 = vmul.f32 %v416_v32, %v2528_v18 }
  0xbd   : > { %v1398_v57 = vsel %vm1381_vm1, %v398_v36, %v1397_v52  ;;  %v422_v21 = vmul.f32 %v416_v32, %v2536_v23  ;;  %v423_v46 = vmul.f32 %v416_v32, %v2539_v24  ;;  %v424_v47 = vmul.f32 %v416_v32, %v2542_v25 }
  0xbe   : > { %v1923_v53 = vpack.c.bf16 %v1398_v57, %v1382_v19  ;;  %v425_v54 = vrot.slane %v417_v29, 4  ;;  %v431_v6 = vrot.slane %v418_v42, 4  ;;  %v437_v58 = vrot.slane %v419_v43, 4 }
  0xbf   : > { %v443_v59 = vrot.slane %v420_v44, 4  ;;  %v449_v30 = vrot.slane %v421_v45, 4  ;;  %v455_v60 = vrot.slane %v422_v21, 4  ;;  %v461_v62 = vrot.slane %v423_v46, 4 }
  0xc0   : > { %1924 = vmatprep.subr.bf16.mxu0 %v1923_v53  ;;  %v426_v39 = vadd.f32 %v425_v54, %v417_v29  ;;  %v432_v20 = vadd.f32 %v431_v6, %v418_v42  ;;  %v438_v55 = vadd.f32 %v437_v58, %v419_v43  ;;  %v467_v63 = vrot.slane %v424_v47, 4 }
  0xc1   : > { %1926 = vmatpush3.bf16.msra.mxu0 %v1923_v53  ;;  %v444_v0 = vadd.f32 %v443_v59, %v420_v44  ;;  %v450_v1 = vadd.f32 %v449_v30, %v421_v45  ;;  %v456_v3 = vadd.f32 %v455_v60, %v422_v21  ;;  %v462_v4 = vadd.f32 %v461_v62, %v423_v46 }
  0xc2   : > { %v427_v5 = vrot.slane %v426_v39, 2  ;;  %v433_v7 = vrot.slane %v432_v20, 2  ;;  %v439_v8 = vrot.slane %v438_v55, 2  ;;  %v468_v13 = vadd.f32 %v467_v63, %v424_v47 }
  0xc3   : > { %v445_v14 = vrot.slane %v444_v0, 2  ;;  %v451_v15 = vrot.slane %v450_v1, 2  ;;  %v457_v16 = vrot.slane %v456_v3, 2  ;;  %v463_v22 = vrot.slane %v462_v4, 2 }
  0xc4   : > { %v428_v26 = vadd.f32 %v427_v5, %v426_v39  ;;  %v434_v36 = vadd.f32 %v433_v7, %v432_v20  ;;  %v440_v37 = vadd.f32 %v439_v8, %v438_v55  ;;  %v469_v35 = vrot.slane %v468_v13, 2 }
  0xc5   : > { %v446_v48 = vadd.f32 %v445_v14, %v444_v0  ;;  %v452_v49 = vadd.f32 %v451_v15, %v450_v1  ;;  %v458_v27 = vadd.f32 %v457_v16, %v456_v3  ;;  %v464_v32 = vadd.f32 %v463_v22, %v462_v4 }
  0xc6   : > { %v429_v50 = vrot.slane %v428_v26, 1  ;;  %v435_v38 = vrot.slane %v434_v36, 1  ;;  %v441_v19 = vrot.slane %v440_v37, 1  ;;  %v2672_v41 = vadd.f32 %v469_v35, %v468_v13 }
  0xc7   : > { %v447_v29 = vrot.slane %v446_v48, 1  ;;  %v453_v42 = vrot.slane %v452_v49, 1  ;;  %v459_v52 = vrot.slane %v458_v27, 1  ;;  %v465_v43 = vrot.slane %v464_v32, 1 }
  0xc8   : > { %v430_v44 = vadd.f32 %v429_v50, %v428_v26  ;;  %v436_v45 = vadd.f32 %v435_v38, %v434_v36  ;;  %v442_v57 = vadd.f32 %v441_v19, %v440_v37  ;;  %v635_v21 = vsel %vm633_vm2, %v634_v28, %v2647_v56 }
  0xc9   : > { %v2679_v46 = vadd.f32 %v447_v29, %v446_v48  ;;  %v2681_v47 = vadd.f32 %v453_v42, %v452_v49  ;;  %v2683_v53 = vadd.f32 %v459_v52, %v458_v27  ;;  %v471_v54 = vrot.slane %v2672_v41, 1 }
  0xca   : > { %v2686_v6 = vadd.f32 %v465_v43, %v464_v32  ;;  %v490_v58 = vmax.f32 %v489_v40, 0.0  ;;  %v1408_v59 = vsel %vm1369_vm6, %v436_v45, %v430_v44  ;;  %v2692_v30 = vmul.f32 3.3333333, %v2657_v51  ;;  %v2036_v43 = vpop.eup %2035 }
  0xcb   : > { %v2695_v61 = vsel %vm1371_vm8, %v442_v57, %v1408_v59  ;;  %v2697_v28 = vmul.f32 3.3333333, %v635_v21  ;;  %v2701_v56 = vmul.f32 %v2569_v9, %v2510_v2  ;;  %vm707_vm4 = vcmp.eq.f32.partialorder %v2510_v2, 0.0 }
  0xcc   : > { %v491_v60 = vmul.f32 %v490_v58, %v2513_v10  ;;  %v492_v34 = vmul.f32 %v490_v58, %v2516_v11  ;;  %v493_v40 = vmul.f32 %v490_v58, %v2519_v12  ;;  %v494_v51 = vmul.f32 %v490_v58, %v2525_v17 }
  0xcd   : > { %v495_v62 = vmul.f32 %v490_v58, %v2528_v18  ;;  %v496_v39 = vmul.f32 %v490_v58, %v2536_v23  ;;  %v497_v20 = vmul.f32 %v490_v58, %v2539_v24  ;;  %v498_v55 = vmul.f32 %v490_v58, %v2542_v25 }
  0xce   : > { %v499_v9 = vrot.slane %v491_v60, 4  ;;  %v505_v63 = vrot.slane %v492_v34, 4  ;;  %v511_v0 = vrot.slane %v493_v40, 4  ;;  %v517_v1 = vrot.slane %v494_v51, 4 }
  0xcf   : > { %v523_v3 = vrot.slane %v495_v62, 4  ;;  %v529_v4 = vrot.slane %v496_v39, 4  ;;  %v535_v5 = vrot.slane %v497_v20, 4  ;;  %v541_v7 = vrot.slane %v498_v55, 4 }
  0xd0   : > { %v500_v8 = vadd.f32 %v499_v9, %v491_v60  ;;  %v506_v13 = vadd.f32 %v505_v63, %v492_v34  ;;  %v512_v14 = vadd.f32 %v511_v0, %v493_v40  ;;  %v518_v15 = vadd.f32 %v517_v1, %v494_v51 }
  0xd1   : > { %v524_v16 = vadd.f32 %v523_v3, %v495_v62  ;;  %v530_v22 = vadd.f32 %v529_v4, %v496_v39  ;;  %v536_v26 = vadd.f32 %v535_v5, %v497_v20  ;;  %v542_v36 = vadd.f32 %v541_v7, %v498_v55 }
  0xd2   : > { %v501_v37 = vrot.slane %v500_v8, 2  ;;  %v507_v35 = vrot.slane %v506_v13, 2  ;;  %v513_v48 = vrot.slane %v512_v14, 2  ;;  %v519_v49 = vrot.slane %v518_v15, 2 }
  0xd3   : > { %v525_v27 = vrot.slane %v524_v16, 2  ;;  %v531_v32 = vrot.slane %v530_v22, 2  ;;  %v537_v50 = vrot.slane %v536_v26, 2  ;;  %v543_v38 = vrot.slane %v542_v36, 2 }
  0xd4   : > { %v502_v19 = vadd.f32 %v501_v37, %v500_v8  ;;  %v508_v29 = vadd.f32 %v507_v35, %v506_v13  ;;  %v514_v42 = vadd.f32 %v513_v48, %v512_v14  ;;  %v520_v52 = vadd.f32 %v519_v49, %v518_v15 }
  0xd5   : > { %v526_v44 = vadd.f32 %v525_v27, %v524_v16  ;;  %v532_v45 = vadd.f32 %v531_v32, %v530_v22  ;;  %v538_v57 = vadd.f32 %v537_v50, %v536_v26  ;;  %v544_v21 = vadd.f32 %v543_v38, %v542_v36 }
  0xd6   : > { %v503_v58 = vrot.slane %v502_v19, 1  ;;  %v509_v59 = vrot.slane %v508_v29, 1  ;;  %v515_v60 = vrot.slane %v514_v42, 1  ;;  %v521_v34 = vrot.slane %v520_v52, 1 }
  0xd7   : > { %v527_v40 = vrot.slane %v526_v44, 1  ;;  %v533_v51 = vrot.slane %v532_v45, 1  ;;  %v539_v62 = vrot.slane %v538_v57, 1  ;;  %v545_v39 = vrot.slane %v544_v21, 1 }
  0xd8   : > { %v504_v20 = vadd.f32 %v503_v58, %v502_v19  ;;  %v510_v55 = vadd.f32 %v509_v59, %v508_v29  ;;  %v516_v9 = vadd.f32 %v515_v60, %v514_v42  ;;  %v522_v63 = vadd.f32 %v521_v34, %v520_v52 }
  0xd9   : > { %v472_v0 = vadd.f32 %v471_v54, %v2672_v41  ;;  %v528_v1 = vadd.f32 %v527_v40, %v526_v44  ;;  %v534_v3 = vadd.f32 %v533_v51, %v532_v45  ;;  %v540_v4 = vadd.f32 %v539_v62, %v538_v57 }
  0xda   : > { %v1410_v5 = vsel %vm1373_vm10, %v2679_v46, %v2695_v61  ;;  %v1424_v7 = vsel %vm1369_vm6, %v510_v55, %v504_v20  ;;  %v563_v8 = vsub.f32 1.0, %v2692_v30  ;;  %v637_v13 = vsub.f32 1.0, %v2697_v28 }
  0xdb   : > { %v546_v14 = vadd.f32 %v545_v39, %v544_v21  ;;  %v1411_v15 = vsel %vm1375_vm11, %v2681_v47, %v1410_v5  ;;  %v1425_v16 = vsel %vm1371_vm8, %v516_v9, %v1424_v7  ;;  %v706_v41 = vsel %vm705_vm3, %v2510_v2, %v2701_v56 }
  0xdc   : > { %v1412_v46 = vsel %vm1377_vm13, %v2683_v53, %v1411_v15  ;;  %v1426_v54 = vsel %vm1373_vm10, %v522_v63, %v1425_v16  ;;  %v564_v61 = vmax.f32 %v563_v8, 0.0  ;;  %v2734_v30 = vmul.f32 %v2036_v43, %v2556_v33 }
  0xdd   : > { %v1413_v28 = vsel %vm1379_vm15, %v2686_v6, %v1412_v46  ;;  %v1427_v47 = vsel %vm1375_vm11, %v528_v1, %v1426_v54  ;;  %v2739_v22 = vmax.f32 %v637_v13, 0.0  ;;  %v2745_v56 = vsel %vm707_vm4, %v708_v31, %v706_v41 }
  0xde   : > { %v1414_v53 = vsel %vm1381_vm1, %v472_v0, %v1413_v28  ;;  %v1428_v26 = vsel %vm1377_vm13, %v534_v3, %v1427_v47  ;;  %v565_v36 = vmul.f32 %v564_v61, %v2513_v10  ;;  %v566_v37 = vmul.f32 %v564_v61, %v2516_v11 }
  0xdf   : > { %v1429_v6 = vsel %vm1379_vm15, %v540_v4, %v1428_v26  ;;  %v567_v35 = vmul.f32 %v564_v61, %v2519_v12  ;;  %v568_v48 = vmul.f32 %v564_v61, %v2525_v17  ;;  %v569_v49 = vmul.f32 %v564_v61, %v2528_v18 }
  0xe0   : > { %v1430_v2 = vsel %vm1381_vm1, %v546_v14, %v1429_v6  ;;  %v570_v31 = vmul.f32 %v564_v61, %v2536_v23  ;;  %v571_v27 = vmul.f32 %v564_v61, %v2539_v24  ;;  %v572_v32 = vmul.f32 %v564_v61, %v2542_v25 }
  0xe1   : > { %v1927_v50 = vpack.c.bf16 %v1430_v2, %v1414_v53  ;;  %v573_v38 = vrot.slane %v565_v36, 4  ;;  %v579_v19 = vrot.slane %v566_v37, 4  ;;  %v585_v29 = vrot.slane %v567_v35, 4 }
  0xe2   : > { %v591_v42 = vrot.slane %v568_v48, 4  ;;  %v597_v52 = vrot.slane %v569_v49, 4  ;;  %v603_v43 = vrot.slane %v570_v31, 4  ;;  %v609_v44 = vrot.slane %v571_v27, 4 }
  0xe3   : > { %1928 = vmatprep.subr.bf16.mxu0 %v1927_v50  ;;  %v574_v45 = vadd.f32 %v573_v38, %v565_v36  ;;  %v580_v57 = vadd.f32 %v579_v19, %v566_v37  ;;  %v586_v21 = vadd.f32 %v585_v29, %v567_v35  ;;  %v615_v58 = vrot.slane %v572_v32, 4 }
  0xe4   : > { %1930 = vmatpush3.bf16.msra.mxu0 %v1927_v50  ;;  %v592_v59 = vadd.f32 %v591_v42, %v568_v48  ;;  %v598_v60 = vadd.f32 %v597_v52, %v569_v49  ;;  %v604_v34 = vadd.f32 %v603_v43, %v570_v31  ;;  %v610_v40 = vadd.f32 %v609_v44, %v571_v27 }
  0xe5   : > { %v575_v51 = vrot.slane %v574_v45, 2  ;;  %v581_v62 = vrot.slane %v580_v57, 2  ;;  %v587_v39 = vrot.slane %v586_v21, 2  ;;  %v616_v20 = vadd.f32 %v615_v58, %v572_v32 }
  0xe6   : > { %v593_v55 = vrot.slane %v592_v59, 2  ;;  %v599_v9 = vrot.slane %v598_v60, 2  ;;  %v605_v63 = vrot.slane %v604_v34, 2  ;;  %v611_v0 = vrot.slane %v610_v40, 2 }
  0xe7   : > { %v576_v1 = vadd.f32 %v575_v51, %v574_v45  ;;  %v582_v3 = vadd.f32 %v581_v62, %v580_v57  ;;  %v588_v4 = vadd.f32 %v587_v39, %v586_v21  ;;  %v617_v5 = vrot.slane %v616_v20, 2 }
  0xe8   : > { %v594_v7 = vadd.f32 %v593_v55, %v592_v59  ;;  %v600_v8 = vadd.f32 %v599_v9, %v598_v60  ;;  %v606_v13 = vadd.f32 %v605_v63, %v604_v34  ;;  %v612_v14 = vadd.f32 %v611_v0, %v610_v40 }
  0xe9   : > { %v577_v15 = vrot.slane %v576_v1, 1  ;;  %v583_v16 = vrot.slane %v582_v3, 1  ;;  %v589_v41 = vrot.slane %v588_v4, 1  ;;  %v618_v46 = vadd.f32 %v617_v5, %v616_v20 }
  0xea   : > { %v595_v54 = vrot.slane %v594_v7, 1  ;;  %v601_v61 = vrot.slane %v600_v8, 1  ;;  %v607_v28 = vrot.slane %v606_v13, 1  ;;  %v613_v47 = vrot.slane %v612_v14, 1 }
  0xeb   : > { %v2759_v53 = vadd.f32 %v577_v15, %v576_v1  ;;  %v2761_v26 = vadd.f32 %v583_v16, %v582_v3  ;;  %v2763_v36 = vadd.f32 %v589_v41, %v588_v4  ;;  %v619_v37 = vrot.slane %v618_v46, 1 }
  0xec   : > { %v2765_v6 = vadd.f32 %v595_v54, %v594_v7  ;;  %v2767_v35 = vadd.f32 %v601_v61, %v600_v8  ;;  %v2769_v48 = vadd.f32 %v607_v28, %v606_v13  ;;  %v2771_v49 = vadd.f32 %v613_v47, %v612_v14 }
  0xed   : > { %v2773_v2 = vadd.f32 %v619_v37, %v618_v46  ;;  %v639_v31 = vmul.f32 %v2739_v22, %v2513_v10  ;;  %v640_v27 = vmul.f32 %v2739_v22, %v2516_v11  ;;  %v641_v32 = vmul.f32 %v2739_v22, %v2519_v12 }
  0xee   : > { %v642_v50 = vmul.f32 %v2739_v22, %v2525_v17  ;;  %v643_v38 = vmul.f32 %v2739_v22, %v2528_v18  ;;  %v644_v19 = vmul.f32 %v2739_v22, %v2536_v23  ;;  %v645_v29 = vmul.f32 %v2739_v22, %v2539_v24 }
  0xef   : > { %v646_v42 = vmul.f32 %v2739_v22, %v2542_v25  ;;  %v647_v52 = vrot.slane %v639_v31, 4  ;;  %v653_v43 = vrot.slane %v640_v27, 4  ;;  %v659_v44 = vrot.slane %v641_v32, 4 }
  0xf0   : > { %v665_v45 = vrot.slane %v642_v50, 4  ;;  %v671_v57 = vrot.slane %v643_v38, 4  ;;  %v677_v21 = vrot.slane %v644_v19, 4  ;;  %v683_v58 = vrot.slane %v645_v29, 4 }
  0xf1   : > { %v648_v59 = vadd.f32 %v647_v52, %v639_v31  ;;  %v654_v60 = vadd.f32 %v653_v43, %v640_v27  ;;  %v660_v34 = vadd.f32 %v659_v44, %v641_v32  ;;  %v689_v40 = vrot.slane %v646_v42, 4 }
  0xf2   : > { %vm779_vm5 = vcmp.eq.f32.partialorder %v2556_v33, inf  ;;  %v666_v51 = vadd.f32 %v665_v45, %v642_v50  ;;  %v672_v62 = vadd.f32 %v671_v57, %v643_v38  ;;  %v678_v39 = vadd.f32 %v677_v21, %v644_v19 }
  0xf3   : > { %v684_v20 = vadd.f32 %v683_v58, %v645_v29  ;;  %v649_v55 = vrot.slane %v648_v59, 2  ;;  %v655_v9 = vrot.slane %v654_v60, 2  ;;  %v661_v22 = vrot.slane %v660_v34, 2 }
  0xf4   : > { %v690_v63 = vadd.f32 %v689_v40, %v646_v42  ;;  %v667_v0 = vrot.slane %v666_v51, 2  ;;  %v673_v1 = vrot.slane %v672_v62, 2  ;;  %v679_v3 = vrot.slane %v678_v39, 2 }
  0xf5   : > { %v685_v4 = vrot.slane %v684_v20, 2  ;;  %v650_v5 = vadd.f32 %v649_v55, %v648_v59  ;;  %v656_v7 = vadd.f32 %v655_v9, %v654_v60  ;;  %v662_v8 = vadd.f32 %v661_v22, %v660_v34 }
  0xf6   : > { %v691_v13 = vrot.slane %v690_v63, 2  ;;  %v668_v14 = vadd.f32 %v667_v0, %v666_v51  ;;  %v674_v15 = vadd.f32 %v673_v1, %v672_v62  ;;  %v680_v16 = vadd.f32 %v679_v3, %v678_v39  ;;  %v2813_v51 = vld [vmem:[%s2453_s5] sm:$0xff]  ;;  %v2819_v62 = vld [vmem:[%s2453_s5 + $0x8] sm:$0xff] }
  0xf7   : > { %v686_v41 = vadd.f32 %v685_v4, %v684_v20  ;;  %v651_v46 = vrot.slane %v650_v5, 1  ;;  %v657_v54 = vrot.slane %v656_v7, 1  ;;  %v663_v61 = vrot.slane %v662_v8, 1 }
  0xf8   : > { %v692_v28 = vadd.f32 %v691_v13, %v690_v63  ;;  %v669_v47 = vrot.slane %v668_v14, 1  ;;  %v675_v37 = vrot.slane %v674_v15, 1  ;;  %v681_v31 = vrot.slane %v680_v16, 1  ;;  %v2833_v63 = vld [vmem:[%s2453_s5 + $0x10] sm:$0xff] }
  0xf9   : > { %v687_v27 = vrot.slane %v686_v41, 1  ;;  %v652_v32 = vadd.f32 %v651_v46, %v650_v5  ;;  %v658_v50 = vadd.f32 %v657_v54, %v656_v7  ;;  %v664_v38 = vadd.f32 %v663_v61, %v662_v8 }
  0xfa   : > { %v693_v19 = vrot.slane %v692_v28, 1  ;;  %v670_v29 = vadd.f32 %v669_v47, %v668_v14  ;;  %v676_v42 = vadd.f32 %v675_v37, %v674_v15  ;;  %v682_v52 = vadd.f32 %v681_v31, %v680_v16 }
  0xfb   : > { %v688_v43 = vadd.f32 %v687_v27, %v686_v41  ;;  %v1440_v45 = vsel %vm1369_vm6, %v2761_v26, %v2759_v53  ;;  %v1456_v57 = vsel %vm1369_vm6, %v658_v50, %v652_v32  ;;  %v710_v21 = vmul.f32 3.3333333, %v2745_v56 }
  0xfc   : > { %v694_v44 = vadd.f32 %v693_v19, %v692_v28  ;;  %v1441_v58 = vsel %vm1371_vm8, %v2763_v36, %v1440_v45  ;;  %v1457_v59 = vsel %vm1371_vm8, %v664_v38, %v1456_v57  ;;  %v780_v60 = vsel %vm779_vm5, %v2556_v33, %v2734_v30 }
  0xfd   : > { %vm781_vm7 = vcmp.eq.f32.partialorder %v2556_v33, 0.0  ;;  %v1442_v34 = vsel %vm1373_vm10, %v2765_v6, %v1441_v58  ;;  %v1458_v53 = vsel %vm1373_vm10, %v670_v29, %v1457_v59  ;;  %v711_v26 = vsub.f32 1.0, %v710_v21 }
  0xfe   : > { %v782_v56 = vand.u32 2147483648, %v2556_v33  ;;  %v1443_v36 = vsel %vm1375_vm11, %v2767_v35, %v1442_v34  ;;  %v1459_v40 = vsel %vm1375_vm11, %v676_v42, %v1458_v53  ;;  %v2816_v30 = vadd.f32 -0.1605108, %v2813_v51 }
  0xff   : > { %v2822_v6 = vadd.f32 0.014885447, %v2819_v62  ;;  %v1444_v39 = vsel %vm1377_vm13, %v2769_v48, %v1443_v36  ;;  %v1460_v33 = vsel %vm1377_vm13, %v682_v52, %v1459_v40  ;;  %v712_v20 = vmax.f32 %v711_v26, 0.0 }
 0x100   : > { %v783_v55 = vsel %vm781_vm7, %v782_v56, %v780_v60  ;;  %v1445_v35 = vsel %vm1379_vm15, %v2771_v49, %v1444_v39  ;;  %v1461_v9 = vsel %vm1379_vm15, %v688_v43, %v1460_v33  ;;  %v2836_v0 = vadd.f32 0.2494468, %v2833_v63 }
 0x101   : > { %v2830_v22 = vmul.f32 3.3333333, %v783_v55  ;;  %v1446_v1 = vsel %vm1381_vm1, %v2773_v2, %v1445_v35  ;;  %v1462_v48 = vsel %vm1381_vm1, %v694_v44, %v1461_v9  ;;  %v713_v3 = vmul.f32 %v712_v20, %v2513_v10 }
 0x102   : > { %v714_v4 = vmul.f32 %v712_v20, %v2516_v11  ;;  %v1931_v5 = vpack.c.bf16 %v1462_v48, %v1446_v1  ;;  %v715_v49 = vmul.f32 %v712_v20, %v2519_v12  ;;  %v716_v7 = vmul.f32 %v712_v20, %v2525_v17 }
 0x103   : > { %v717_v8 = vmul.f32 %v712_v20, %v2528_v18  ;;  %v718_v13 = vmul.f32 %v712_v20, %v2536_v23  ;;  %v719_v14 = vmul.f32 %v712_v20, %v2539_v24  ;;  %v720_v15 = vmul.f32 %v712_v20, %v2542_v25 }
 0x104   : > { %v721_v2 = vrot.slane %v713_v3, 4  ;;  %1932 = vmatprep.subr.bf16.mxu0 %v1931_v5  ;;  %v727_v16 = vrot.slane %v714_v4, 4  ;;  %v733_v41 = vrot.slane %v715_v49, 4  ;;  %v739_v10 = vrot.slane %v716_v7, 4 }
 0x105   : > { %v745_v46 = vrot.slane %v717_v8, 4  ;;  %1934 = vmatpush3.bf16.msra.mxu0 %v1931_v5  ;;  %v751_v54 = vrot.slane %v718_v13, 4  ;;  %v757_v12 = vrot.slane %v719_v14, 4  ;;  %v763_v61 = vrot.slane %v720_v15, 4 }
 0x106   : > { %v722_v11 = vadd.f32 %v721_v2, %v713_v3  ;;  %v728_v17 = vadd.f32 %v727_v16, %v714_v4  ;;  %v734_v28 = vadd.f32 %v733_v41, %v715_v49  ;;  %v740_v18 = vadd.f32 %v739_v10, %v716_v7  ;;  %v2883_v16 = vld [vmem:[%s2461_s11] sm:$0xff]  ;;  %v2887_v41 = vld [vmem:[%s2461_s11 + $0x8] sm:$0xff] }
 0x107   : > { %v746_v47 = vadd.f32 %v745_v46, %v717_v8  ;;  %v752_v37 = vadd.f32 %v751_v54, %v718_v13  ;;  %v758_v24 = vadd.f32 %v757_v12, %v719_v14  ;;  %v764_v31 = vadd.f32 %v763_v61, %v720_v15  ;;  %v2891_v46 = vld [vmem:[%s2461_s11 + $0x10] sm:$0xff]  ;;  %v2895_v54 = vld [vmem:[%s2461_s11 + $0x18] sm:$0xff]  ;;  %v2899_v61 = vld [vmem:[%s2461_s11 + $0x20] sm:$0xff] }
 0x108   : > { %v723_v23 = vrot.slane %v722_v11, 2  ;;  %v729_v25 = vrot.slane %v728_v17, 2  ;;  %v735_v27 = vrot.slane %v734_v28, 2  ;;  %v741_v32 = vrot.slane %v740_v18, 2 }
 0x109   : > { %v747_v50 = vrot.slane %v746_v47, 2  ;;  %v753_v19 = vrot.slane %v752_v37, 2  ;;  %v759_v29 = vrot.slane %v758_v24, 2  ;;  %v765_v42 = vrot.slane %v764_v31, 2 }
 0x10a   : > { %v724_v38 = vadd.f32 %v723_v23, %v722_v11  ;;  %v730_v52 = vadd.f32 %v729_v25, %v728_v17  ;;  %v736_v43 = vadd.f32 %v735_v27, %v734_v28  ;;  %v742_v44 = vadd.f32 %v741_v32, %v740_v18  ;;  %v2903_v28 = vld [vmem:[%s2461_s11 + $0x28] sm:$0xff] }
 0x10b   : > { %v748_v45 = vadd.f32 %v747_v50, %v746_v47  ;;  %v754_v21 = vadd.f32 %v753_v19, %v752_v37  ;;  %v760_v58 = vadd.f32 %v759_v29, %v758_v24  ;;  %v766_v59 = vadd.f32 %v765_v42, %v764_v31  ;;  %v2907_v47 = vld [vmem:[%s2461_s11 + $0x30] sm:$0xff]  ;;  %v2911_v37 = vld [vmem:[%s2461_s11 + $0x38] sm:$0xff] }
 0x10c   : > { %v725_v57 = vrot.slane %v724_v38, 1  ;;  %v731_v60 = vrot.slane %v730_v52, 1  ;;  %v737_v34 = vrot.slane %v736_v43, 1  ;;  %v743_v53 = vrot.slane %v742_v44, 1 }
 0x10d   : > { %v749_v26 = vrot.slane %v748_v45, 1  ;;  %v755_v36 = vrot.slane %v754_v21, 1  ;;  %v761_v40 = vrot.slane %v760_v58, 1  ;;  %v767_v39 = vrot.slane %v766_v59, 1 }
 0x10e   : > { %v726_v56 = vadd.f32 %v725_v57, %v724_v38  ;;  %v732_v33 = vadd.f32 %v731_v60, %v730_v52  ;;  %v738_v20 = vadd.f32 %v737_v34, %v736_v43  ;;  %v744_v55 = vadd.f32 %v743_v53, %v742_v44 }
 0x10f   : > { %v846_v35 = vmul.f32 %v2816_v30, %v2816_v30  ;;  %v2851_v9 = vadd.f32 %v749_v26, %v748_v45  ;;  %v2853_v1 = vadd.f32 %v755_v36, %v754_v21  ;;  %v2855_v48 = vadd.f32 %v761_v40, %v760_v58 }
 0x110   : > { %v785_v3 = vsub.f32 1.0, %v2830_v22  ;;  %v2858_v4 = vadd.f32 %v767_v39, %v766_v59  ;;  %v1472_v5 = vsel %vm1369_vm6, %v732_v33, %v726_v56  ;;  %v847_v49 = vmul.f32 %v2822_v6, %v2822_v6 }
 0x111   : > { %v1849_v30 = vadd.f32 0.27056798, %v2813_v51  ;;  %v1473_v8 = vsel %vm1371_vm8, %v738_v20, %v1472_v5  ;;  %v2867_v13 = vmul.f32 %v2836_v0, %v2836_v0  ;;  %v2870_v22 = vadd.f32 -0.029359844, %v2819_v62 }
 0x112   : > { %v786_v7 = vmax.f32 %v785_v3, 0.0  ;;  %v2873_v14 = vsel %vm1373_vm10, %v744_v55, %v1473_v8  ;;  %v2875_v6 = vadd.f32 %v847_v49, %v846_v35  ;;  %v2878_v15 = vadd.f32 0.11891163, %v2833_v63 }
 0x113   : > { %v2880_v2 = vmul.f32 %v1849_v30, %v1849_v30 }
 0x114   : > { %v787_v0 = vmul.f32 %v2883_v16, %v786_v7  ;;  %v788_v10 = vmul.f32 %v2887_v41, %v786_v7  ;;  %v789_v11 = vmul.f32 %v2891_v46, %v786_v7  ;;  %v790_v12 = vmul.f32 %v2895_v54, %v786_v7 }
 0x115   : > { %v791_v17 = vmul.f32 %v2899_v61, %v786_v7  ;;  %v792_v18 = vmul.f32 %v2903_v28, %v786_v7  ;;  %v793_v23 = vmul.f32 %v2907_v47, %v786_v7  ;;  %v794_v24 = vmul.f32 %v2911_v37, %v786_v7 }
 0x116   : > { %v795_v31 = vrot.slane %v787_v0, 4  ;;  %v801_v25 = vrot.slane %v788_v10, 4  ;;  %v807_v27 = vrot.slane %v789_v11, 4  ;;  %v813_v32 = vrot.slane %v790_v12, 4 }
 0x117   : > { %v819_v50 = vrot.slane %v791_v17, 4  ;;  %v825_v38 = vrot.slane %v792_v18, 4  ;;  %v831_v19 = vrot.slane %v793_v23, 4  ;;  %v837_v29 = vrot.slane %v794_v24, 4 }
 0x118   : > { %v796_v42 = vadd.f32 %v795_v31, %v787_v0  ;;  %v802_v52 = vadd.f32 %v801_v25, %v788_v10  ;;  %v808_v43 = vadd.f32 %v807_v27, %v789_v11  ;;  %v814_v44 = vadd.f32 %v813_v32, %v790_v12 }
 0x119   : > { %v820_v45 = vadd.f32 %v819_v50, %v791_v17  ;;  %v826_v57 = vadd.f32 %v825_v38, %v792_v18  ;;  %v832_v21 = vadd.f32 %v831_v19, %v793_v23  ;;  %v838_v58 = vadd.f32 %v837_v29, %v794_v24 }
 0x11a   : > { %v797_v59 = vrot.slane %v796_v42, 2  ;;  %v803_v60 = vrot.slane %v802_v52, 2  ;;  %v809_v34 = vrot.slane %v808_v43, 2  ;;  %v815_v53 = vrot.slane %v814_v44, 2 }
 0x11b   : > { %v821_v26 = vrot.slane %v820_v45, 2  ;;  %v827_v56 = vrot.slane %v826_v57, 2  ;;  %v833_v36 = vrot.slane %v832_v21, 2  ;;  %v839_v40 = vrot.slane %v838_v58, 2 }
 0x11c   : > { %v798_v39 = vadd.f32 %v797_v59, %v796_v42  ;;  %v804_v33 = vadd.f32 %v803_v60, %v802_v52  ;;  %v810_v20 = vadd.f32 %v809_v34, %v808_v43  ;;  %v816_v55 = vadd.f32 %v815_v53, %v814_v44 }
 0x11d   : > { %v822_v35 = vadd.f32 %v821_v26, %v820_v45  ;;  %v828_v3 = vadd.f32 %v827_v56, %v826_v57  ;;  %v834_v5 = vadd.f32 %v833_v36, %v832_v21  ;;  %v840_v49 = vadd.f32 %v839_v40, %v838_v58 }
 0x11e   : > { %v799_v30 = vrot.slane %v798_v39, 1  ;;  %v805_v7 = vrot.slane %v804_v33, 1  ;;  %v811_v8 = vrot.slane %v810_v20, 1  ;;  %v817_v0 = vrot.slane %v816_v55, 1 }
 0x11f   : > { %v823_v10 = vrot.slane %v822_v35, 1  ;;  %v829_v11 = vrot.slane %v828_v3, 1  ;;  %v835_v12 = vrot.slane %v834_v5, 1  ;;  %v841_v17 = vrot.slane %v840_v49, 1 }
 0x120   : > { %v800_v18 = vadd.f32 %v799_v30, %v798_v39  ;;  %v806_v23 = vadd.f32 %v805_v7, %v804_v33  ;;  %v812_v24 = vadd.f32 %v811_v8, %v810_v20  ;;  %v818_v31 = vadd.f32 %v817_v0, %v816_v55 }
 0x121   : > { %v824_v25 = vadd.f32 %v823_v10, %v822_v35  ;;  %v830_v27 = vadd.f32 %v829_v11, %v828_v3  ;;  %v836_v32 = vadd.f32 %v835_v12, %v834_v5  ;;  %v1852_v50 = vadd.f32 0.023798436, %v2813_v51 }
 0x122   : > { %v1475_v38 = vsel %vm1375_vm11, %v2851_v9, %v2873_v14  ;;  %v1488_v19 = vsel %vm1369_vm6, %v806_v23, %v800_v18  ;;  %v850_v29 = vadd.f32 %v2867_v13, %v2875_v6  ;;  %v921_v42 = vmul.f32 %v2870_v22, %v2870_v22 }
 0x123   : > { %v842_v52 = vadd.f32 %v841_v17, %v840_v49  ;;  %v1476_v43 = vsel %vm1377_vm13, %v2853_v1, %v1475_v38  ;;  %v1489_v44 = vsel %vm1371_vm8, %v812_v24, %v1488_v19  ;;  %v1853_v45 = vadd.f32 -0.20919356, %v2819_v62 }
 0x124   : > { %v1477_v57 = vsel %vm1379_vm15, %v2855_v48, %v1476_v43  ;;  %v1490_v9 = vsel %vm1373_vm10, %v818_v31, %v1489_v44  ;;  %2037 = vrsqrt.f32 %v850_v29  ;;  %v923_v13 = vmul.f32 %v2878_v15, %v2878_v15 }
 0x125   : > { %v1478_v22 = vsel %vm1381_vm1, %v2858_v4, %v1477_v57  ;;  %v1491_v14 = vsel %vm1375_vm11, %v824_v25, %v1490_v9  ;;  %v922_v6 = vadd.f32 %v921_v42, %v2880_v2  ;;  %v1854_v21 = vadd.f32 0.20947719, %v2833_v63 }
 0x126   : > { %v1492_v1 = vsel %vm1377_vm13, %v830_v27, %v1491_v14  ;;  %v994_v58 = vmul.f32 %v1852_v50, %v1852_v50  ;;  %v995_v59 = vmul.f32 %v1853_v45, %v1853_v45  ;;  %v1855_v60 = vadd.f32 0.18062107, %v2813_v51 }
 0x127   : > { %v1493_v48 = vsel %vm1379_vm15, %v836_v32, %v1492_v1  ;;  %v1856_v34 = vadd.f32 0.2000199, %v2819_v62  ;;  %v924_v53 = vadd.f32 %v923_v13, %v922_v6  ;;  %v997_v4 = vmul.f32 %v1854_v21, %v1854_v21 }
 0x128   : > { %v1494_v15 = vsel %vm1381_vm1, %v842_v52, %v1493_v48  ;;  %v1857_v26 = vadd.f32 0.124808066, %v2833_v63  ;;  %v996_v36 = vadd.f32 %v995_v59, %v994_v58  ;;  %v1068_v40 = vmul.f32 %v1855_v60, %v1855_v60 }
 0x129   : > { %v1935_v56 = vpack.c.bf16 %v1494_v15, %v1478_v22  ;;  %v1069_v2 = vmul.f32 %v1856_v34, %v1856_v34  ;;  %2039 = vrsqrt.f32 %v924_v53  ;;  %vm853_vm9 = vcmp.eq.f32.partialorder %v850_v29, inf }
 0x12a   : > { %v2943_v39 = vadd.f32 %v997_v4, %v996_v36  ;;  %v1858_v33 = vadd.f32 -0.2642273, %v2813_v51  ;;  %v1859_v20 = vadd.f32 -0.09441103, %v2819_v62  ;;  %v1860_v55 = vadd.f32 0.09736263, %v2833_v63 }
 0x12b   : > { %1936 = vmatprep.subr.bf16.mxu0 %v1935_v56  ;;  %v1861_v35 = vadd.f32 -0.108378135, %v2813_v51  ;;  %vm855_vm12 = vcmp.eq.f32.partialorder %v850_v29, 0.0  ;;  %v1070_v3 = vadd.f32 %v1069_v2, %v1068_v40  ;;  %v1071_v5 = vmul.f32 %v1857_v26, %v1857_v26 }
 0x12c   : > { %1938 = vmatpush3.bf16.msra.mxu0 %v1935_v56  ;;  %2041 = vrsqrt.f32 %v2943_v39  ;;  %v856_v30 = vand.u32 2147483648, %v850_v29  ;;  %v1142_v7 = vmul.f32 %v1858_v33, %v1858_v33  ;;  %v1143_v8 = vmul.f32 %v1859_v20, %v1859_v20 }
 0x12d   : > { %v1145_v0 = vmul.f32 %v1860_v55, %v1860_v55  ;;  %v1862_v11 = vadd.f32 0.10365454, %v2819_v62  ;;  %v1863_v12 = vadd.f32 0.256357, %v2833_v63  ;;  %v1216_v17 = vmul.f32 %v1861_v35, %v1861_v35 }
 0x12e   : > { %v2038_v49 = vpop.eup %2037  ;;  %v2953_v23 = vadd.f32 %v1071_v5, %v1070_v3  ;;  %v1144_v24 = vadd.f32 %v1143_v8, %v1142_v7  ;;  %v1864_v32 = vadd.f32 -0.017827425, %v2813_v51  ;;  %v1865_v50 = vadd.f32 -0.27706006, %v2819_v62 }
 0x12f   : > { %v852_v10 = vmul.f32 %v2038_v49, %v850_v29  ;;  %v1217_v31 = vmul.f32 %v1862_v11, %v1862_v11  ;;  %v1219_v27 = vmul.f32 %v1863_v12, %v1863_v12  ;;  %v1866_v52 = vadd.f32 0.105493546, %v2833_v63 }
 0x130   : > { %v2958_v19 = vadd.f32 %v1145_v0, %v1144_v24  ;;  %vm927_vm14 = vcmp.eq.f32.partialorder %v924_v53, inf  ;;  %vm929_vm0 = vcmp.eq.f32.partialorder %v924_v53, 0.0  ;;  %v930_v44 = vand.u32 2147483648, %v924_v53 }
 0x131   : > { %v854_v18 = vsel %vm853_vm9, %v850_v29, %v852_v10  ;;  %v1218_v42 = vadd.f32 %v1217_v31, %v1216_v17  ;;  %v1004_v29 = vand.u32 2147483648, %v2943_v39  ;;  %2043 = vrsqrt.f32 %v2953_v23 }
 0x132   : > { %v857_v25 = vsel %vm855_vm12, %v856_v30, %v854_v18  ;;  %v1078_v51 = vand.u32 2147483648, %v2953_v23  ;;  %v2966_v62 = vmul.f32 %v1864_v32, %v1864_v32  ;;  %v2968_v13 = vmul.f32 %v1865_v50, %v1865_v50 }
 0x133   : > { %v858_v38 = vmul.f32 3.3333333, %v857_v25  ;;  %v2040_v43 = vpop.eup %2039  ;;  %v2964_v9 = vadd.f32 %v1219_v27, %v1218_v42  ;;  %2045 = vrsqrt.f32 %v2958_v19  ;;  %v2971_v1 = vmul.f32 %v1866_v52, %v1866_v52 }
 0x134   : > { %v926_v57 = vmul.f32 %v2040_v43, %v924_v53  ;;  %v1152_v58 = vand.u32 2147483648, %v2958_v19  ;;  %vm1001_vm2 = vcmp.eq.f32.partialorder %v2943_v39, inf  ;;  %vm1003_vm3 = vcmp.eq.f32.partialorder %v2943_v39, 0.0 }
 0x135   : > { %v859_v45 = vsub.f32 1.0, %v858_v38  ;;  %2047 = vrsqrt.f32 %v2964_v9  ;;  %vm1075_vm4 = vcmp.eq.f32.partialorder %v2953_v23, inf  ;;  %vm1077_vm5 = vcmp.eq.f32.partialorder %v2953_v23, 0.0 }
 0x136   : > { %v2042_v22 = vpop.eup %2041  ;;  %v928_v14 = vsel %vm927_vm14, %v924_v53, %v926_v57  ;;  %vm1149_vm7 = vcmp.eq.f32.partialorder %v2958_v19, inf  ;;  %vm1151_vm9 = vcmp.eq.f32.partialorder %v2958_v19, 0.0  ;;  %vm1223_vm12 = vcmp.eq.f32.partialorder %v2964_v9, inf }
 0x137   : > { %v860_v63 = vmax.f32 %v859_v45, 0.0  ;;  %v2973_v6 = vsel %vm929_vm0, %v930_v44, %v928_v14  ;;  %v2976_v21 = vmul.f32 %v2042_v22, %v2943_v39  ;;  %vm1225_vm14 = vcmp.eq.f32.partialorder %v2964_v9, 0.0 }
 0x139   : > { %v861_v48 = vmul.f32 %v2883_v16, %v860_v63  ;;  %v862_v59 = vmul.f32 %v2887_v41, %v860_v63  ;;  %v863_v60 = vmul.f32 %v2891_v46, %v860_v63  ;;  %v864_v34 = vmul.f32 %v2895_v54, %v860_v63 }
 0x13a   : > { %v865_v15 = vmul.f32 %v2899_v61, %v860_v63  ;;  %v866_v53 = vmul.f32 %v2903_v28, %v860_v63  ;;  %v867_v4 = vmul.f32 %v2907_v47, %v860_v63  ;;  %v868_v26 = vmul.f32 %v2911_v37, %v860_v63 }
 0x13b   : > { %v869_v56 = vrot.slane %v861_v48, 4  ;;  %v875_v36 = vrot.slane %v862_v59, 4  ;;  %v881_v40 = vrot.slane %v863_v60, 4  ;;  %v887_v2 = vrot.slane %v864_v34, 4  ;;  %v2044_v11 = vpop.eup %2043 }
 0x13c   : > { %v893_v33 = vrot.slane %v865_v15, 4  ;;  %v899_v20 = vrot.slane %v866_v53, 4  ;;  %v905_v55 = vrot.slane %v867_v4, 4  ;;  %v911_v35 = vrot.slane %v868_v26, 4 }
 0x13d   : > { %v870_v3 = vadd.f32 %v869_v56, %v861_v48  ;;  %v876_v5 = vadd.f32 %v875_v36, %v862_v59  ;;  %v882_v49 = vadd.f32 %v881_v40, %v863_v60  ;;  %v888_v30 = vadd.f32 %v887_v2, %v864_v34  ;;  %v2046_v50 = vpop.eup %2045 }
 0x13e   : > { %v894_v7 = vadd.f32 %v893_v33, %v865_v15  ;;  %v900_v8 = vadd.f32 %v899_v20, %v866_v53  ;;  %v906_v0 = vadd.f32 %v905_v55, %v867_v4  ;;  %v912_v10 = vadd.f32 %v911_v35, %v868_v26 }
 0x13f   : > { %v871_v12 = vrot.slane %v870_v3, 2  ;;  %v877_v17 = vrot.slane %v876_v5, 2  ;;  %v883_v18 = vrot.slane %v882_v49, 2  ;;  %v889_v24 = vrot.slane %v888_v30, 2  ;;  %v2048_v44 = vpop.eup %2047 }
 0x140   : > { %v895_v31 = vrot.slane %v894_v7, 2  ;;  %v901_v25 = vrot.slane %v900_v8, 2  ;;  %v907_v27 = vrot.slane %v906_v0, 2  ;;  %v913_v32 = vrot.slane %v912_v10, 2 }
 0x141   : > { %v872_v38 = vadd.f32 %v871_v12, %v870_v3  ;;  %v878_v42 = vadd.f32 %v877_v17, %v876_v5  ;;  %v884_v52 = vadd.f32 %v883_v18, %v882_v49  ;;  %v890_v43 = vadd.f32 %v889_v24, %v888_v30 }
 0x142   : > { %v896_v45 = vadd.f32 %v895_v31, %v894_v7  ;;  %v902_v57 = vadd.f32 %v901_v25, %v900_v8  ;;  %v908_v22 = vadd.f32 %v907_v27, %v906_v0  ;;  %v914_v63 = vadd.f32 %v913_v32, %v912_v10 }
 0x143   : > { %v873_v14 = vrot.slane %v872_v38, 1  ;;  %v879_v48 = vrot.slane %v878_v42, 1  ;;  %v885_v59 = vrot.slane %v884_v52, 1  ;;  %v891_v60 = vrot.slane %v890_v43, 1 }
 0x144   : > { %v897_v34 = vrot.slane %v896_v45, 1  ;;  %v903_v15 = vrot.slane %v902_v57, 1  ;;  %v909_v53 = vrot.slane %v908_v22, 1  ;;  %v915_v20 = vrot.slane %v914_v63, 1 }
 0x145   : > { %v874_v4 = vadd.f32 %v873_v14, %v872_v38  ;;  %v880_v26 = vadd.f32 %v879_v48, %v878_v42  ;;  %v886_v56 = vadd.f32 %v885_v59, %v884_v52  ;;  %v892_v36 = vadd.f32 %v891_v60, %v890_v43 }
 0x146   : > { %v898_v40 = vadd.f32 %v897_v34, %v896_v45  ;;  %v904_v2 = vadd.f32 %v903_v15, %v902_v57  ;;  %v910_v33 = vadd.f32 %v909_v53, %v908_v22  ;;  %v932_v55 = vmul.f32 3.3333333, %v2973_v6 }
 0x147   : > { %v1504_v35 = vsel %vm1369_vm6, %v880_v26, %v874_v4  ;;  %v1002_v3 = vsel %vm1001_vm2, %v2943_v39, %v2976_v21  ;;  %v1074_v5 = vmul.f32 %v2044_v11, %v2953_v23  ;;  %v1148_v7 = vmul.f32 %v2046_v50, %v2958_v19 }
 0x148   : > { %v1505_v49 = vsel %vm1371_vm8, %v886_v56, %v1504_v35  ;;  %v1005_v30 = vsel %vm1003_vm3, %v1004_v29, %v1002_v3  ;;  %v1222_v6 = vmul.f32 %v2048_v44, %v2964_v9  ;;  %v933_v8 = vsub.f32 1.0, %v932_v55 }
 0x149   : > { %v1506_v0 = vsel %vm1373_vm10, %v892_v36, %v1505_v49  ;;  %v3010_v10 = vmul.f32 3.3333333, %v1005_v30  ;;  %v1076_v21 = vsel %vm1075_vm4, %v2953_v23, %v1074_v5  ;;  %v3015_v11 = vadd.f32 %v915_v20, %v914_v63 }
 0x14a   : > { %v1507_v12 = vsel %vm1375_vm11, %v898_v40, %v1506_v0  ;;  %v1079_v39 = vsel %vm1077_vm5, %v1078_v51, %v1076_v21  ;;  %v1150_v29 = vsel %vm1149_vm7, %v2958_v19, %v1148_v7  ;;  %v934_v17 = vmax.f32 %v933_v8, 0.0 }
 0x14b   : > { %v1508_v18 = vsel %vm1377_vm13, %v904_v2, %v1507_v12  ;;  %v1007_v24 = vsub.f32 1.0, %v3010_v10  ;;  %v3030_v31 = vsel %vm1223_vm12, %v2964_v9, %v1222_v6  ;;  %v3035_v27 = vmul.f32 3.3333333, %v1079_v39 }
 0x14c   : > { %v3033_v25 = vsel %vm1379_vm15, %v910_v33, %v1508_v18  ;;  %v3041_v23 = vsel %vm1151_vm9, %v1152_v58, %v1150_v29  ;;  %v1226_v51 = vand.u32 2147483648, %v2964_v9  ;;  %v935_v32 = vmul.f32 %v2883_v16, %v934_v17 }
 0x14d   : > { %v936_v50 = vmul.f32 %v2887_v41, %v934_v17  ;;  %v937_v38 = vmul.f32 %v2891_v46, %v934_v17  ;;  %v938_v42 = vmul.f32 %v2895_v54, %v934_v17  ;;  %v939_v52 = vmul.f32 %v2899_v61, %v934_v17 }
 0x14e   : > { %v940_v43 = vmul.f32 %v2903_v28, %v934_v17  ;;  %v941_v44 = vmul.f32 %v2907_v47, %v934_v17  ;;  %v942_v19 = vmul.f32 %v2911_v37, %v934_v17  ;;  %v943_v58 = vrot.slane %v935_v32, 4 }
 0x14f   : > { %v949_v45 = vrot.slane %v936_v50, 4  ;;  %v955_v57 = vrot.slane %v937_v38, 4  ;;  %v961_v22 = vrot.slane %v938_v42, 4  ;;  %v967_v63 = vrot.slane %v939_v52, 4 }
 0x150   : > { %v973_v14 = vrot.slane %v940_v43, 4  ;;  %v979_v48 = vrot.slane %v941_v44, 4  ;;  %v985_v59 = vrot.slane %v942_v19, 4  ;;  %v944_v60 = vadd.f32 %v943_v58, %v935_v32 }
 0x151   : > { %v950_v34 = vadd.f32 %v949_v45, %v936_v50  ;;  %v956_v15 = vadd.f32 %v955_v57, %v937_v38  ;;  %v962_v53 = vadd.f32 %v961_v22, %v938_v42  ;;  %v968_v4 = vadd.f32 %v967_v63, %v939_v52 }
 0x152   : > { %v974_v26 = vadd.f32 %v973_v14, %v940_v43  ;;  %v980_v56 = vadd.f32 %v979_v48, %v941_v44  ;;  %v986_v36 = vadd.f32 %v985_v59, %v942_v19  ;;  %v945_v40 = vrot.slane %v944_v60, 2 }
 0x153   : > { %v951_v2 = vrot.slane %v950_v34, 2  ;;  %v957_v33 = vrot.slane %v956_v15, 2  ;;  %v963_v20 = vrot.slane %v962_v53, 2  ;;  %v969_v55 = vrot.slane %v968_v4, 2 }
 0x154   : > { %v975_v35 = vrot.slane %v974_v26, 2  ;;  %v981_v3 = vrot.slane %v980_v56, 2  ;;  %v987_v5 = vrot.slane %v986_v36, 2  ;;  %v946_v49 = vadd.f32 %v945_v40, %v944_v60 }
 0x155   : > { %v952_v30 = vadd.f32 %v951_v2, %v950_v34  ;;  %v958_v7 = vadd.f32 %v957_v33, %v956_v15  ;;  %v964_v6 = vadd.f32 %v963_v20, %v962_v53  ;;  %v970_v8 = vadd.f32 %v969_v55, %v968_v4 }
 0x156   : > { %v976_v0 = vadd.f32 %v975_v35, %v974_v26  ;;  %v982_v21 = vadd.f32 %v981_v3, %v980_v56  ;;  %v988_v12 = vadd.f32 %v987_v5, %v986_v36  ;;  %v947_v39 = vrot.slane %v946_v49, 1 }
 0x157   : > { %v953_v29 = vrot.slane %v952_v30, 1  ;;  %v959_v17 = vrot.slane %v958_v7, 1  ;;  %v965_v18 = vrot.slane %v964_v6, 1  ;;  %v971_v32 = vrot.slane %v970_v8, 1 }
 0x158   : > { %v977_v50 = vrot.slane %v976_v0, 1  ;;  %v983_v38 = vrot.slane %v982_v21, 1  ;;  %v989_v42 = vrot.slane %v988_v12, 1  ;;  %v948_v52 = vadd.f32 %v947_v39, %v946_v49 }
 0x159   : > { %v954_v43 = vadd.f32 %v953_v29, %v952_v30  ;;  %v960_v44 = vadd.f32 %v959_v17, %v958_v7  ;;  %v966_v19 = vadd.f32 %v965_v18, %v964_v6  ;;  %v972_v58 = vadd.f32 %v971_v32, %v970_v8 }
 0x15a   : > { %v978_v45 = vadd.f32 %v977_v50, %v976_v0  ;;  %v984_v57 = vadd.f32 %v983_v38, %v982_v21  ;;  %v3055_v22 = vadd.f32 %v2968_v13, %v2966_v62  ;;  %v990_v63 = vadd.f32 %v989_v42, %v988_v12 }
 0x15b   : > { %v1510_v14 = vsel %vm1381_vm1, %v3015_v11, %v3033_v25  ;;  %v1520_v48 = vsel %vm1369_vm6, %v954_v43, %v948_v52  ;;  %v1008_v59 = vmax.f32 %v1007_v24, 0.0  ;;  %v1081_v34 = vsub.f32 1.0, %v3035_v27 }
 0x15c   : > { %v1521_v60 = vsel %vm1371_vm8, %v960_v44, %v1520_v48  ;;  %v3066_v15 = vmul.f32 3.3333333, %v3041_v23  ;;  %v3073_v62 = vsel %vm1225_vm14, %v1226_v51, %v3030_v31  ;;  %vm1610_vm3 = vcmask 982016  }
 0x15d   : > { %v1522_v13 = vsel %vm1373_vm10, %v966_v19, %v1521_v60  ;;  %v1009_v11 = vmul.f32 %v2883_v16, %v1008_v59  ;;  %v1010_v10 = vmul.f32 %v2887_v41, %v1008_v59  ;;  %v1011_v24 = vmul.f32 %v2891_v46, %v1008_v59 }
 0x15e   : > { %v1523_v25 = vsel %vm1375_vm11, %v972_v58, %v1522_v13  ;;  %v1012_v23 = vmul.f32 %v2895_v54, %v1008_v59  ;;  %v1013_v53 = vmul.f32 %v2899_v61, %v1008_v59  ;;  %v1014_v4 = vmul.f32 %v2903_v28, %v1008_v59 }
 0x15f   : > { %v1524_v9 = vsel %vm1377_vm13, %v978_v45, %v1523_v25  ;;  %v1015_v31 = vmul.f32 %v2907_v47, %v1008_v59  ;;  %v1016_v51 = vmul.f32 %v2911_v37, %v1008_v59  ;;  %v1017_v26 = vrot.slane %v1009_v11, 4 }
 0x160   : > { %v1525_v56 = vsel %vm1379_vm15, %v984_v57, %v1524_v9  ;;  %v1023_v36 = vrot.slane %v1010_v10, 4  ;;  %v1029_v40 = vrot.slane %v1011_v24, 4  ;;  %v1035_v2 = vrot.slane %v1012_v23, 4 }
 0x161   : > { %v1526_v33 = vsel %vm1381_vm1, %v990_v63, %v1525_v56  ;;  %v1018_v20 = vadd.f32 %v1017_v26, %v1009_v11  ;;  %v1041_v55 = vrot.slane %v1013_v53, 4  ;;  %v1047_v35 = vrot.slane %v1014_v4, 4 }
 0x162   : > { %v1939_v3 = vpack.c.bf16 %v1526_v33, %v1510_v14  ;;  %v1024_v5 = vadd.f32 %v1023_v36, %v1010_v10  ;;  %v1030_v49 = vadd.f32 %v1029_v40, %v1011_v24  ;;  %v1036_v30 = vadd.f32 %v1035_v2, %v1012_v23 }
 0x163   : > { %v1019_v7 = vrot.slane %v1018_v20, 2  ;;  %v1042_v6 = vadd.f32 %v1041_v55, %v1013_v53  ;;  %v1048_v8 = vadd.f32 %v1047_v35, %v1014_v4  ;;  %v1053_v0 = vrot.slane %v1015_v31, 4 }
 0x164   : > { %1940 = vmatprep.subr.bf16.mxu0 %v1939_v3  ;;  %v1025_v21 = vrot.slane %v1024_v5, 2  ;;  %v1031_v12 = vrot.slane %v1030_v49, 2  ;;  %v1037_v39 = vrot.slane %v1036_v30, 2  ;;  %v1059_v29 = vrot.slane %v1016_v51, 4 }
 0x165   : > { %1942 = vmatpush3.bf16.msra.mxu0 %v1939_v3  ;;  %v1020_v17 = vadd.f32 %v1019_v7, %v1018_v20  ;;  %v1043_v18 = vrot.slane %v1042_v6, 2  ;;  %v1049_v32 = vrot.slane %v1048_v8, 2  ;;  %v1054_v50 = vadd.f32 %v1053_v0, %v1015_v31 }
 0x166   : > { %v1026_v38 = vadd.f32 %v1025_v21, %v1024_v5  ;;  %v1032_v42 = vadd.f32 %v1031_v12, %v1030_v49  ;;  %v1038_v52 = vadd.f32 %v1037_v39, %v1036_v30  ;;  %v1060_v43 = vadd.f32 %v1059_v29, %v1016_v51 }
 0x167   : > { %v1021_v44 = vrot.slane %v1020_v17, 1  ;;  %v1044_v19 = vadd.f32 %v1043_v18, %v1042_v6  ;;  %v1050_v58 = vadd.f32 %v1049_v32, %v1048_v8  ;;  %v1055_v45 = vrot.slane %v1054_v50, 2 }
 0x168   : > { %v1027_v57 = vrot.slane %v1026_v38, 1  ;;  %v1033_v63 = vrot.slane %v1032_v42, 1  ;;  %v1039_v14 = vrot.slane %v1038_v52, 1  ;;  %v1061_v48 = vrot.slane %v1060_v43, 2 }
 0x169   : > { %v1022_v59 = vadd.f32 %v1021_v44, %v1020_v17  ;;  %v1045_v60 = vrot.slane %v1044_v19, 1  ;;  %v1051_v13 = vrot.slane %v1050_v58, 1  ;;  %v1056_v11 = vadd.f32 %v1055_v45, %v1054_v50 }
 0x16a   : > { %v1028_v10 = vadd.f32 %v1027_v57, %v1026_v38  ;;  %v3088_v24 = vadd.f32 %v1033_v63, %v1032_v42  ;;  %v1062_v25 = vadd.f32 %v1061_v48, %v1060_v43  ;;  %v3092_v23 = vadd.f32 %v2971_v1, %v3055_v22 }
 0x16b   : > { %v3094_v53 = vadd.f32 %v1039_v14, %v1038_v52  ;;  %v3096_v4 = vadd.f32 %v1045_v60, %v1044_v19  ;;  %v1057_v9 = vrot.slane %v1056_v11, 1  ;;  %v1082_v31 = vmax.f32 %v1081_v34, 0.0 }
 0x16c   : > { %v3100_v51 = vadd.f32 %v1051_v13, %v1050_v58  ;;  %v1063_v26 = vrot.slane %v1062_v25, 1  ;;  %v1536_v56 = vsel %vm1369_vm6, %v1028_v10, %v1022_v59  ;;  %v1155_v36 = vsub.f32 1.0, %v3066_v15 }
 0x16d   : > { %v1083_v40 = vmul.f32 %v2883_v16, %v1082_v31  ;;  %v1084_v1 = vmul.f32 %v2887_v41, %v1082_v31  ;;  %v1085_v22 = vmul.f32 %v2891_v46, %v1082_v31  ;;  %v3108_v2 = vmul.f32 3.3333333, %v3073_v62 }
 0x16e   : > { %v3110_v33 = vadd.f32 %v1057_v9, %v1056_v11  ;;  %v1086_v27 = vmul.f32 %v2895_v54, %v1082_v31  ;;  %v1087_v34 = vmul.f32 %v2899_v61, %v1082_v31  ;;  %v1088_v20 = vmul.f32 %v2903_v28, %v1082_v31 }
 0x16f   : > { %v1089_v55 = vmul.f32 %v2907_v47, %v1082_v31  ;;  %v1090_v35 = vmul.f32 %v2911_v37, %v1082_v31  ;;  %v1091_v3 = vrot.slane %v1083_v40, 4  ;;  %v1097_v5 = vrot.slane %v1084_v1, 4 }
 0x170   : > { %v1103_v49 = vrot.slane %v1085_v22, 4  ;;  %v1109_v30 = vrot.slane %v1086_v27, 4  ;;  %v1115_v7 = vrot.slane %v1087_v34, 4  ;;  %v1121_v6 = vrot.slane %v1088_v20, 4 }
 0x171   : > { %v1092_v62 = vadd.f32 %v1091_v3, %v1083_v40  ;;  %v1098_v8 = vadd.f32 %v1097_v5, %v1084_v1  ;;  %v1127_v0 = vrot.slane %v1089_v55, 4  ;;  %v1133_v21 = vrot.slane %v1090_v35, 4 }
 0x172   : > { %v1104_v12 = vadd.f32 %v1103_v49, %v1085_v22  ;;  %v1110_v39 = vadd.f32 %v1109_v30, %v1086_v27  ;;  %v1116_v29 = vadd.f32 %v1115_v7, %v1087_v34  ;;  %v1122_v17 = vadd.f32 %v1121_v6, %v1088_v20 }
 0x173   : > { %v1093_v18 = vrot.slane %v1092_v62, 2  ;;  %v1099_v32 = vrot.slane %v1098_v8, 2  ;;  %v1128_v50 = vadd.f32 %v1127_v0, %v1089_v55  ;;  %v1134_v38 = vadd.f32 %v1133_v21, %v1090_v35 }
 0x174   : > { %v1105_v42 = vrot.slane %v1104_v12, 2  ;;  %v1111_v52 = vrot.slane %v1110_v39, 2  ;;  %v1117_v43 = vrot.slane %v1116_v29, 2  ;;  %v1123_v44 = vrot.slane %v1122_v17, 2 }
 0x175   : > { %v1094_v19 = vadd.f32 %v1093_v18, %v1092_v62  ;;  %v1100_v58 = vadd.f32 %v1099_v32, %v1098_v8  ;;  %v1129_v45 = vrot.slane %v1128_v50, 2  ;;  %v1135_v57 = vrot.slane %v1134_v38, 2 }
 0x176   : > { %v1106_v63 = vadd.f32 %v1105_v42, %v1104_v12  ;;  %v1112_v14 = vadd.f32 %v1111_v52, %v1110_v39  ;;  %v1118_v48 = vadd.f32 %v1117_v43, %v1116_v29  ;;  %v1124_v59 = vadd.f32 %v1123_v44, %v1122_v17 }
 0x177   : > { %v1095_v60 = vrot.slane %v1094_v19, 1  ;;  %v1101_v13 = vrot.slane %v1100_v58, 1  ;;  %v1130_v11 = vadd.f32 %v1129_v45, %v1128_v50  ;;  %v1136_v10 = vadd.f32 %v1135_v57, %v1134_v38 }
 0x178   : > { %v1107_v9 = vrot.slane %v1106_v63, 1  ;;  %v1113_v31 = vrot.slane %v1112_v14, 1  ;;  %v1119_v40 = vrot.slane %v1118_v48, 1  ;;  %v1125_v1 = vrot.slane %v1124_v59, 1 }
 0x179   : > { %v1096_v22 = vadd.f32 %v1095_v60, %v1094_v19  ;;  %v1102_v27 = vadd.f32 %v1101_v13, %v1100_v58  ;;  %v1131_v34 = vrot.slane %v1130_v11, 1  ;;  %v1137_v20 = vrot.slane %v1136_v10, 1 }
 0x17a   : > { %v1064_v55 = vadd.f32 %v1063_v26, %v1062_v25  ;;  %v1108_v35 = vadd.f32 %v1107_v9, %v1106_v63  ;;  %v1114_v3 = vadd.f32 %v1113_v31, %v1112_v14  ;;  %v1120_v5 = vadd.f32 %v1119_v40, %v1118_v48 }
 0x17b   : > { %v1126_v49 = vadd.f32 %v1125_v1, %v1124_v59  ;;  %v1132_v30 = vadd.f32 %v1131_v34, %v1130_v11  ;;  %v1537_v7 = vsel %vm1371_vm8, %v3088_v24, %v1536_v56  ;;  %v1552_v6 = vsel %vm1369_vm6, %v1102_v27, %v1096_v22 }
 0x17c   : > { %v1138_v62 = vadd.f32 %v1137_v20, %v1136_v10  ;;  %v1538_v8 = vsel %vm1373_vm10, %v3094_v53, %v1537_v7  ;;  %v1553_v0 = vsel %vm1371_vm8, %v1108_v35, %v1552_v6  ;;  %v1156_v21 = vmax.f32 %v1155_v36, 0.0 }
 0x17d   : > { %v1539_v25 = vsel %vm1375_vm11, %v3096_v4, %v1538_v8  ;;  %v1554_v26 = vsel %vm1373_vm10, %v1114_v3, %v1553_v0  ;;  %v1229_v12 = vsub.f32 1.0, %v3108_v2  ;;  %2049 = vrsqrt.f32 %v3092_v23 }
 0x17e   : > { %v1540_v24 = vsel %vm1377_vm13, %v3100_v51, %v1539_v25  ;;  %v1555_v56 = vsel %vm1375_vm11, %v1120_v5, %v1554_v26  ;;  %v1157_v53 = vmul.f32 %v2883_v16, %v1156_v21  ;;  %v1158_v39 = vmul.f32 %v2887_v41, %v1156_v21 }
 0x17f   : > { %v1541_v15 = vsel %vm1379_vm15, %v3110_v33, %v1540_v24  ;;  %v1556_v4 = vsel %vm1377_vm13, %v1126_v49, %v1555_v56  ;;  %v1159_v36 = vmul.f32 %v2891_v46, %v1156_v21  ;;  %v1160_v29 = vmul.f32 %v2895_v54, %v1156_v21 }
 0x180   : > { %v1542_v17 = vsel %vm1381_vm1, %v1064_v55, %v1541_v15  ;;  %v1557_v18 = vsel %vm1379_vm15, %v1132_v30, %v1556_v4  ;;  %v1161_v51 = vmul.f32 %v2899_v61, %v1156_v21  ;;  %v1162_v32 = vmul.f32 %v2903_v28, %v1156_v21 }
 0x181   : > { %v1558_v50 = vsel %vm1381_vm1, %v1138_v62, %v1557_v18  ;;  %v1163_v38 = vmul.f32 %v2907_v47, %v1156_v21  ;;  %v1164_v33 = vmul.f32 %v2911_v37, %v1156_v21  ;;  %v1165_v42 = vrot.slane %v1157_v53, 4 }
 0x182   : > { %v1943_v52 = vpack.c.bf16 %v1558_v50, %v1542_v17  ;;  %v1171_v43 = vrot.slane %v1158_v39, 4  ;;  %v1177_v44 = vrot.slane %v1159_v36, 4  ;;  %v1183_v19 = vrot.slane %v1160_v29, 4 }
 0x183   : > { %v1166_v58 = vadd.f32 %v1165_v42, %v1157_v53  ;;  %v1189_v45 = vrot.slane %v1161_v51, 4  ;;  %v1195_v57 = vrot.slane %v1162_v32, 4  ;;  %v1201_v63 = vrot.slane %v1163_v38, 4 }
 0x184   : > { %1944 = vmatprep.subr.bf16.mxu0 %v1943_v52  ;;  %v1172_v14 = vadd.f32 %v1171_v43, %v1158_v39  ;;  %v1178_v48 = vadd.f32 %v1177_v44, %v1159_v36  ;;  %v1184_v59 = vadd.f32 %v1183_v19, %v1160_v29  ;;  %v1207_v60 = vrot.slane %v1164_v33, 4 }
 0x185   : > { %1946 = vmatpush3.bf16.msra.mxu0 %v1943_v52  ;;  %v1167_v13 = vrot.slane %v1166_v58, 2  ;;  %v1190_v11 = vadd.f32 %v1189_v45, %v1161_v51  ;;  %v1196_v10 = vadd.f32 %v1195_v57, %v1162_v32  ;;  %v1202_v9 = vadd.f32 %v1201_v63, %v1163_v38 }
 0x186   : > { %v1173_v31 = vrot.slane %v1172_v14, 2  ;;  %v1179_v40 = vrot.slane %v1178_v48, 2  ;;  %v1185_v1 = vrot.slane %v1184_v59, 2  ;;  %v1208_v22 = vadd.f32 %v1207_v60, %v1164_v33 }
 0x187   : > { %v2050_v27 = vpop.eup %2049  ;;  %v1168_v34 = vadd.f32 %v1167_v13, %v1166_v58  ;;  %v1191_v20 = vrot.slane %v1190_v11, 2  ;;  %v1197_v55 = vrot.slane %v1196_v10, 2  ;;  %v1203_v35 = vrot.slane %v1202_v9, 2 }
 0x188   : > { %v1174_v3 = vadd.f32 %v1173_v31, %v1172_v14  ;;  %v1180_v5 = vadd.f32 %v1179_v40, %v1178_v48  ;;  %v1186_v49 = vadd.f32 %v1185_v1, %v1184_v59  ;;  %v1209_v30 = vrot.slane %v1208_v22, 2 }
 0x189   : > { %v1169_v7 = vrot.slane %v1168_v34, 1  ;;  %v1192_v6 = vadd.f32 %v1191_v20, %v1190_v11  ;;  %v1198_v62 = vadd.f32 %v1197_v55, %v1196_v10  ;;  %v1204_v8 = vadd.f32 %v1203_v35, %v1202_v9 }
 0x18a   : > { %v1175_v0 = vrot.slane %v1174_v3, 1  ;;  %v1181_v21 = vrot.slane %v1180_v5, 1  ;;  %v1187_v25 = vrot.slane %v1186_v49, 1  ;;  %v3147_v26 = vadd.f32 %v1209_v30, %v1208_v22 }
 0x18b   : > { %v1170_v24 = vadd.f32 %v1169_v7, %v1168_v34  ;;  %v1193_v56 = vrot.slane %v1192_v6, 1  ;;  %v1199_v53 = vrot.slane %v1198_v62, 1  ;;  %v1205_v39 = vrot.slane %v1204_v8, 1 }
 0x18c   : > { %v1176_v15 = vadd.f32 %v1175_v0, %v1174_v3  ;;  %v3149_v4 = vadd.f32 %v1181_v21, %v1180_v5  ;;  %v3151_v36 = vadd.f32 %v1187_v25, %v1186_v49  ;;  %v1211_v17 = vrot.slane %v3147_v26, 1 }
 0x18d   : > { %v3153_v29 = vadd.f32 %v1193_v56, %v1192_v6  ;;  %v1230_v18 = vmax.f32 %v1229_v12, 0.0  ;;  %v3158_v51 = vadd.f32 %v1199_v53, %v1198_v62  ;;  %v3160_v32 = vadd.f32 %v1205_v39, %v1204_v8 }
 0x18e   : > { %v1568_v50 = vsel %vm1369_vm6, %v1176_v15, %v1170_v24  ;;  %v1296_v38 = vmul.f32 %v2050_v27, %v3092_v23  ;;  %vm1297_vm0 = vcmp.eq.f32.partialorder %v3092_v23, inf  ;;  %v1212_v15 = vadd.f32 %v1211_v17, %v3147_v26 }
 0x18f   : > { %v1231_v33 = vmul.f32 %v2883_v16, %v1230_v18  ;;  %v1232_v42 = vmul.f32 %v2887_v41, %v1230_v18  ;;  %v1233_v52 = vmul.f32 %v2891_v46, %v1230_v18  ;;  %v1234_v43 = vmul.f32 %v2895_v54, %v1230_v18 }
 0x190   : > { %v1235_v44 = vmul.f32 %v2899_v61, %v1230_v18  ;;  %v1236_v2 = vmul.f32 %v2903_v28, %v1230_v18  ;;  %v1237_v12 = vmul.f32 %v2907_v47, %v1230_v18  ;;  %v1238_v19 = vmul.f32 %v2911_v37, %v1230_v18 }
 0x191   : > { %v1239_v58 = vrot.slane %v1231_v33, 4  ;;  %v1245_v45 = vrot.slane %v1232_v42, 4  ;;  %v1251_v57 = vrot.slane %v1233_v52, 4  ;;  %v1257_v63 = vrot.slane %v1234_v43, 4 }
 0x192   : > { %v1263_v14 = vrot.slane %v1235_v44, 4  ;;  %v1269_v16 = vrot.slane %v1236_v2, 4  ;;  %v1275_v48 = vrot.slane %v1237_v12, 4  ;;  %v1281_v41 = vrot.slane %v1238_v19, 4 }
 0x193   : > { %v1240_v46 = vadd.f32 %v1239_v58, %v1231_v33  ;;  %v1246_v54 = vadd.f32 %v1245_v45, %v1232_v42  ;;  %v1252_v59 = vadd.f32 %v1251_v57, %v1233_v52  ;;  %v1258_v61 = vadd.f32 %v1257_v63, %v1234_v43  ;;  %v1608_v42 = vld [vmem:[#allocation7] sm:$0xff] }
 0x194   : > { %v1264_v60 = vadd.f32 %v1263_v14, %v1235_v44  ;;  %v1270_v28 = vadd.f32 %v1269_v16, %v1236_v2  ;;  %v1276_v13 = vadd.f32 %v1275_v48, %v1237_v12  ;;  %v1282_v47 = vadd.f32 %v1281_v41, %v1238_v19  ;;  %1920 = vmatprep.mubr.msk.f32.mxu0 %vm1610_vm3, %v1608_v42  ;;  %v2062_v41 = vld [vmem:[%s2461_s11] sm:$0xff] }
 0x195   : > { %v1241_v11 = vrot.slane %v1240_v46, 2  ;;  %v1247_v37 = vrot.slane %v1246_v54, 2  ;;  %v1253_v10 = vrot.slane %v1252_v59, 2  ;;  %v1259_v9 = vrot.slane %v1258_v61, 2 }
 0x196   : > { %v1265_v31 = vrot.slane %v1264_v60, 2  ;;  %v1271_v40 = vrot.slane %v1270_v28, 2  ;;  %v1277_v1 = vrot.slane %v1276_v13, 2  ;;  %v1283_v22 = vrot.slane %v1282_v47, 2 }
 0x197   : > { %v1242_v27 = vadd.f32 %v1241_v11, %v1240_v46  ;;  %v1248_v34 = vadd.f32 %v1247_v37, %v1246_v54  ;;  %v1254_v20 = vadd.f32 %v1253_v10, %v1252_v59  ;;  %v1260_v55 = vadd.f32 %v1259_v9, %v1258_v61  ;;  %v2063_v54 = vld [vmem:[%s2461_s11 + $0x8] sm:$0xff]  ;;  %v2064_v59 = vld [vmem:[%s2461_s11 + $0x10] sm:$0xff] }
 0x198   : > { %v1266_v35 = vadd.f32 %v1265_v31, %v1264_v60  ;;  %v1272_v3 = vadd.f32 %v1271_v40, %v1270_v28  ;;  %v1278_v5 = vadd.f32 %v1277_v1, %v1276_v13  ;;  %v1284_v49 = vadd.f32 %v1283_v22, %v1282_v47  ;;  %v2065_v60 = vld [vmem:[%s2461_s11 + $0x18] sm:$0xff]  ;;  %v2066_v13 = vld [vmem:[%s2461_s11 + $0x20] sm:$0xff]  ;;  %v2067_v11 = vld [vmem:[%s2461_s11 + $0x28] sm:$0xff] }
 0x199   : > { %v1243_v30 = vrot.slane %v1242_v27, 1  ;;  %v1249_v7 = vrot.slane %v1248_v34, 1  ;;  %v1255_v6 = vrot.slane %v1254_v20, 1  ;;  %v1261_v62 = vrot.slane %v1260_v55, 1  ;;  %v2068_v10 = vld [vmem:[%s2461_s11 + $0x30] sm:$0xff]  ;;  %v2069_v31 = vld [vmem:[%s2461_s11 + $0x38] sm:$0xff] }
 0x19a   : > { %v1267_v8 = vrot.slane %v1266_v35, 1  ;;  %v1273_v0 = vrot.slane %v1272_v3, 1  ;;  %v1279_v21 = vrot.slane %v1278_v5, 1  ;;  %v1285_v25 = vrot.slane %v1284_v49, 1 }
 0x19b   : > { %v1244_v24 = vadd.f32 %v1243_v30, %v1242_v27  ;;  %v1250_v56 = vadd.f32 %v1249_v7, %v1248_v34  ;;  %v1256_v53 = vadd.f32 %v1255_v6, %v1254_v20  ;;  %v1262_v39 = vadd.f32 %v1261_v62, %v1260_v55 }
 0x19c   : > { %v1268_v18 = vadd.f32 %v1267_v8, %v1266_v35  ;;  %v1274_v33 = vadd.f32 %v1273_v0, %v1272_v3  ;;  %vm1299_vm2 = vcmp.eq.f32.partialorder %v3092_v23, 0.0  ;;  %v1569_v52 = vsel %vm1371_vm8, %v3149_v4, %v1568_v50 }
 0x19d   : > { %v1584_v43 = vsel %vm1369_vm6, %v1250_v56, %v1244_v24  ;;  %v1298_v44 = vsel %vm1297_vm0, %v3092_v23, %v1296_v38  ;;  %v1300_v2 = vand.u32 2147483648, %v3092_v23  ;;  %v1280_v12 = vadd.f32 %v1279_v21, %v1278_v5 }
 0x19e   : > { %v1570_v26 = vsel %vm1373_vm10, %v3151_v36, %v1569_v52  ;;  %v1585_v17 = vsel %vm1371_vm8, %v1256_v53, %v1584_v43  ;;  %v1286_v19 = vadd.f32 %v1285_v25, %v1284_v49 }
 0x19f   : > { %v1571_v58 = vsel %vm1375_vm11, %v3153_v29, %v1570_v26  ;;  %v1586_v4 = vsel %vm1373_vm10, %v1262_v39, %v1585_v17  ;;  %v1301_v50 = vsel %vm1299_vm2, %v1300_v2, %v1298_v44 }
 0x1a0   : > { %v1572_v23 = vsel %vm1377_vm13, %v3158_v51, %v1571_v58  ;;  %v1587_v36 = vsel %vm1375_vm11, %v1268_v18, %v1586_v4  ;;  %v1302_v38 = vmul.f32 3.3333333, %v1301_v50 }
 0x1a1   : > { %v1573_v45 = vsel %vm1379_vm15, %v3160_v32, %v1572_v23  ;;  %v1588_v29 = vsel %vm1377_vm13, %v1274_v33, %v1587_v36 }
 0x1a2   : > { %v1574_v57 = vsel %vm1381_vm1, %v1212_v15, %v1573_v45  ;;  %v1589_v63 = vsel %vm1379_vm15, %v1280_v12, %v1588_v29  ;;  %v1303_v14 = vsub.f32 1.0, %v1302_v38 }
 0x1a3   : > { %v1590_v16 = vsel %vm1381_vm1, %v1286_v19, %v1589_v63 }
 0x1a4   : > { %v1947_v51 = vpack.c.bf16 %v1590_v16, %v1574_v57  ;;  %v1304_v48 = vmax.f32 %v1303_v14, 0.0 }
 0x1a6   : > { %1948 = vmatprep.subr.bf16.mxu0 %v1947_v51  ;;  %v1305_v46 = vmul.f32 %v2062_v41, %v1304_v48  ;;  %v1306_v32 = vmul.f32 %v2063_v54, %v1304_v48  ;;  %v1307_v61 = vmul.f32 %v2064_v59, %v1304_v48  ;;  %v1308_v28 = vmul.f32 %v2065_v60, %v1304_v48 }
 0x1a7   : > { %1950 = vmatpush3.bf16.msra.mxu0 %v1947_v51  ;;  %v1309_v47 = vmul.f32 %v2066_v13, %v1304_v48  ;;  %v1310_v37 = vmul.f32 %v2067_v11, %v1304_v48  ;;  %v1311_v9 = vmul.f32 %v2068_v10, %v1304_v48  ;;  %v1312_v40 = vmul.f32 %v2069_v31, %v1304_v48 }
 0x1a8   : > { %v1313_v1 = vrot.slane %v1305_v46, 4  ;;  %v1319_v22 = vrot.slane %v1306_v32, 4  ;;  %v1325_v27 = vrot.slane %v1307_v61, 4  ;;  %v1331_v34 = vrot.slane %v1308_v28, 4 }
 0x1a9   : > { %v1337_v20 = vrot.slane %v1309_v47, 4  ;;  %v1343_v55 = vrot.slane %v1310_v37, 4  ;;  %v1349_v35 = vrot.slane %v1311_v9, 4  ;;  %v1355_v3 = vrot.slane %v1312_v40, 4 }
 0x1aa   : > { %v1314_v5 = vadd.f32 %v1313_v1, %v1305_v46  ;;  %v1320_v49 = vadd.f32 %v1319_v22, %v1306_v32  ;;  %v1326_v30 = vadd.f32 %v1325_v27, %v1307_v61  ;;  %v1332_v7 = vadd.f32 %v1331_v34, %v1308_v28  ;;  %v1609_v28 = vld [vmem:[#allocation7 + $0x8] sm:$0xff] }
 0x1ab   : > { %v1338_v6 = vadd.f32 %v1337_v20, %v1309_v47  ;;  %v1344_v62 = vadd.f32 %v1343_v55, %v1310_v37  ;;  %v1350_v8 = vadd.f32 %v1349_v35, %v1311_v9  ;;  %v1356_v0 = vadd.f32 %v1355_v3, %v1312_v40 }
 0x1ac   : > { %v1315_v21 = vrot.slane %v1314_v5, 2  ;;  %v1321_v25 = vrot.slane %v1320_v49, 2  ;;  %v1327_v24 = vrot.slane %v1326_v30, 2  ;;  %v1333_v56 = vrot.slane %v1332_v7, 2 }
 0x1ad   : > { %v1339_v53 = vrot.slane %v1338_v6, 2  ;;  %v1345_v39 = vrot.slane %v1344_v62, 2  ;;  %v1351_v15 = vrot.slane %v1350_v8, 2  ;;  %v1357_v18 = vrot.slane %v1356_v0, 2 }
 0x1ae   : > { %v1316_v33 = vadd.f32 %v1315_v21, %v1314_v5  ;;  %v1322_v42 = vadd.f32 %v1321_v25, %v1320_v49  ;;  %v1328_v52 = vadd.f32 %v1327_v24, %v1326_v30  ;;  %v1334_v43 = vadd.f32 %v1333_v56, %v1332_v7 }
 0x1af   : > { %v1340_v44 = vadd.f32 %v1339_v53, %v1338_v6  ;;  %v1346_v2 = vadd.f32 %v1345_v39, %v1344_v62  ;;  %v1352_v12 = vadd.f32 %v1351_v15, %v1350_v8  ;;  %v1358_v26 = vadd.f32 %v1357_v18, %v1356_v0 }
 0x1b0   : > { %v1317_v17 = vrot.slane %v1316_v33, 1  ;;  %v1323_v19 = vrot.slane %v1322_v42, 1  ;;  %v1329_v58 = vrot.slane %v1328_v52, 1  ;;  %v1335_v4 = vrot.slane %v1334_v43, 1 }
 0x1b1   : > { %v1341_v50 = vrot.slane %v1340_v44, 1  ;;  %v1347_v23 = vrot.slane %v1346_v2, 1  ;;  %v1353_v36 = vrot.slane %v1352_v12, 1  ;;  %v1359_v38 = vrot.slane %v1358_v26, 1 }
 0x1b2   : > { %v1318_v45 = vadd.f32 %v1317_v17, %v1316_v33  ;;  %v1324_v29 = vadd.f32 %v1323_v19, %v1322_v42  ;;  %v1330_v57 = vadd.f32 %v1329_v58, %v1328_v52  ;;  %v1336_v63 = vadd.f32 %v1335_v4, %v1334_v43 }
 0x1b3   : > { %v1342_v14 = vadd.f32 %v1341_v50, %v1340_v44  ;;  %v1348_v16 = vadd.f32 %v1347_v23, %v1346_v2  ;;  %v1354_v48 = vadd.f32 %v1353_v36, %v1352_v12  ;;  %v1360_v46 = vadd.f32 %v1359_v38, %v1358_v26 }
 0x1b4   : > { %v1600_v51 = vsel %vm1369_vm6, %v1324_v29, %v1318_v45 }
 0x1b5   : > { %v1601_v41 = vsel %vm1371_vm8, %v1330_v57, %v1600_v51 }
 0x1b6   : > { %v1602_v54 = vsel %vm1373_vm10, %v1336_v63, %v1601_v41 }
 0x1b7   : > { %v1603_v32 = vsel %vm1375_vm11, %v1342_v14, %v1602_v54 }
 0x1b8   : > { %v1604_v59 = vsel %vm1377_vm13, %v1348_v16, %v1603_v32 }
 0x1b9   : > { %v1605_v61 = vsel %vm1379_vm15, %v1354_v48, %v1604_v59 }
 0x1ba   : > { %v1606_v60 = vsel %vm1381_vm1, %v1360_v46, %v1605_v61 }
 0x1bb   : > { %1918 = vmatprep.subr.mxu0 %v1606_v60 }
 0x1bc   : > { %1919 = vmatpush3.msra.mxu0 %v1606_v60 }
 0x1bd   : > { %1921 = vmatmul.mubr.msk.f32.vlgmr.msra.gmra.mrb[0].mxu0 %vm1610_vm3, %v1609_v28 }
 0x290   : > { %v1922_v13 = vpop.f32.mrb[0].mxu0 }
 0x291   : > { %1693 = vst [vmem:[%s240_s27 + $0x8] sm:$0xff] %v1922_v13  ;;  %v1683_v47 = vpop.f32.mrb[1].mxu0 }
 0x292   : > { %1692 = vst [vmem:[%s240_s27] sm:$0xff] %v1683_v47 }
 0x293   : > { %2171 = shalt.err (!%p2168_p7)
}
 0x294   : > { %s2172_s22 = scalar_lea.hbm %s3221_s10, 256  ;;  %s2176_s8 = scalar_lea.hbm %s3268_s3, 512 }
 0x295   : > { %p2173_p9 = scmp.ne.s32.totalorder %s3221_s10, %s2172_s22  ;;  %p2177_p8 = scmp.lt.u32.totalorder %s3221_s10, %s3268_s3 }
 0x296   : > { %p2178_p11 = scmp.lt.u32.totalorder %s2176_s8, %s2172_s22  ;;  %p2180_p4 = scmp.lt.u32.totalorder %s2172_s22, %s3221_s10 }
 0x297   : > { %p2174_p10 = pnand %p2173_p9, %p3294_p6 }
 0x298   : > { %p2179_p1 = por %p2178_p11, %p2177_p8 }
 0x299   : > { %p2175_p12 = pneg %p2174_p10 }
 0x29a   : > { %p2181_p5 = por %p2180_p4, %p2179_p1 }
 0x29c   : > { %p2182_p13 = pnand %p2181_p5, %p2175_p12 }
 0x29e   : > { %2185 = shalt.err (!%p2182_p13)
}
 0x29f   : > { %s2241_s19 = smov 128   ;;  %s2242_s4 = smov 256  }
 0x2a0   : > { %s2243_s11 = smov 8  }
 0x2a1   : > { %1961 = dma.vmem_to_hbm [thread:$0]  (%p3294_p6), %s3216_s7, 256, %s3221_s10, %s1695_s17, %s2241_s19, %s2242_s4, %s2243_s11  }
 0x2a2 PF: > { %s1722_s23 = sand.u32 1, %s2220_s12   ;;  %p3295_p0 = scmp.ne.s32.totalorder %s3281_s25, 0 }
 0x2a3   : > { %p3296_p3 = scmp.ge.s32.totalorder %s2232_s15, 2  ;;  %s1723_s27 = scalar_lea.sflag [#allocation4], %s1722_s23 }
 0x2a5   : > { %p1975_p2 = pnand %p3296_p3, %p3295_p0 }
 0x2a7   : > { %2215 = dma.done.wait (!%p1975_p2), %s1723_s27, 256  }
 0x2a8   : > { %2217 = vsyncadd (!%p1975_p2), %s1723_s27, 4294967040  ;;  %s3297_s28 = sld [smem:[#allocation13_spill]]  ;;  %p19_p7 = scmp.ge.s32.totalorder %s2289_s18, 4  }
 0x2a9   : > { %s3298_s12 = smov %s2224_s13  ;;  %s3299_s13 = smov %s2228_s14 }
 0x2aa   : > { %s3301_s15 = smov %s2289_s18  ;;  %21 = sbr.rel (!%p19_p7) target bundleno = 10 (0xa), region = 96 }
 0x2ae   : > { %s3300_s14 = smov %s3297_s28 }
 0x2b1   :  { %1728 = vsyncpa [#allocation3], 1 }
 0x2b2   :  { %1730 = vsyncpa [#allocation3 + $0x1], 1 }
 0x2b3   :  { %1731 = vsyncpa [#allocation6], 1 }
 0x2b4   :  { %1733 = vsyncpa [#allocation6 + $0x1], 1 }
 0x2b5   :  { %1734 = vsyncpa [#allocation4], 1 }
 0x2b6   :  { %1736 = vsyncpa [#allocation4 + $0x1], 1 }

</bundles_post_ra>
